<compile_context>
chip_gen: v5e
topology: v5e:2x2
jax: 0.10.0
libtpu: 0.0.40
codegen_flags: <defaults>
</compile_context>

<pallas_src>
import functools

import jax
import jax.numpy as jnp
from jax import lax
from jax.experimental import pallas as pl
from jax.experimental.pallas import tpu as pltpu

HEADS = 4
DIM_HEAD = 32
INNER = HEADS * DIM_HEAD  # 128


def pos_extraction_kernel(
    x_ref,
    w1_ref, bn1s_ref, bn1b_ref,
    w2_ref, bn2s_ref, bn2b_ref,
    wqkv_ref,
    wout_ref, bout_ref, bnos_ref, bnob_ref,
    wffn_ref, bnfs_ref, bnfb_ref,
    o_ref,
    head_scratch,
    *, batch_tile, n_points,
):
    f32 = jnp.float32
    m = batch_tile * n_points
    x = x_ref[0].astype(f32)                      # [C, M]  (M = Bt*N, lane-dense)

    # ---- FCBNReLU1DRes: relu(bn2(conv2(relu(bn1(conv1(x))))) + x) ----
    h = jnp.dot(w1_ref[...], x, preferred_element_type=f32)
    h = h * bn1s_ref[...] + bn1b_ref[...]
    h = jnp.maximum(h, 0.0)
    h = jnp.dot(w2_ref[...], h, preferred_element_type=f32)
    h = h * bn2s_ref[...] + bn2b_ref[...]
    y = jnp.maximum(h + x, 0.0)                   # [C, M]

    # ---- Attention (channels-first the whole way; block-diagonal mask keeps the
    #      Bt folded batches independent while matmuls stay lane-dense) ----
    scale = DIM_HEAD ** (-0.5)
    qkv = jnp.dot(wqkv_ref[...], y, preferred_element_type=f32)   # [3*INNER, M]

    if batch_tile > 1:
        ri = lax.broadcasted_iota(jnp.int32, (m, m), 0)
        ci = lax.broadcasted_iota(jnp.int32, (m, m), 1)
        same = jnp.zeros((m, m), jnp.bool_)
        for b in range(batch_tile):   # static unroll; batch_tile is small
            lo, hi = b * n_points, (b + 1) * n_points
            same = same | ((ri >= lo) & (ri < hi) & (ci >= lo) & (ci < hi))
        mask_bias = jnp.where(same, 0.0, -1e30).astype(f32)        # [M, M]
    else:
        mask_bias = None

    for hd in range(HEADS):
        qh = qkv[hd * DIM_HEAD:(hd + 1) * DIM_HEAD, :]
        kh = qkv[INNER + hd * DIM_HEAD:INNER + (hd + 1) * DIM_HEAD, :]
        vh = qkv[2 * INNER + hd * DIM_HEAD:2 * INNER + (hd + 1) * DIM_HEAD, :]
        # dots[i, j] = sum_d q[d, i] * k[d, j]   -> [M, M]
        dots = lax.dot_general(qh, kh, (((0,), (0,)), ((), ())),
                               preferred_element_type=f32) * scale
        if mask_bias is not None:
            dots = dots + mask_bias
        dots = dots - jnp.max(dots, axis=-1, keepdims=True)
        e = jnp.exp(dots)
        attn = e * pl.reciprocal(jnp.sum(e, axis=-1, keepdims=True), approx=True)
        # out[d, i] = sum_j v[d, j] * attn[i, j]  -> [dh, M]
        oh = lax.dot_general(vh, attn, (((1,), (1,)), ((), ())),
                             preferred_element_type=f32)
        # rearrange 'b h n d -> b (h d) n': head hd -> channel rows [hd*dh,(hd+1)*dh)
        head_scratch[hd * DIM_HEAD:(hd + 1) * DIM_HEAD, :] = oh

    att = jnp.dot(wout_ref[...], head_scratch[...],
                  preferred_element_type=f32) + bout_ref[...]
    att = att * bnos_ref[...] + bnob_ref[...]
    att = jnp.maximum(att + y, 0.0)               # relu(attention(x) + x)

    # ---- FFN: relu(att + bn(conv(att))) ----
    ffn = jnp.dot(wffn_ref[...], att, preferred_element_type=f32)
    ffn = ffn * bnfs_ref[...] + bnfb_ref[...]
    o_ref[0] = jnp.maximum(att + ffn, 0.0).astype(o_ref.dtype)


def _pick_batch_tile(batch, n_points):
    """Smallest divisor Bt of `batch` with Bt*N >= 128 (lane-dense slab), preferring
    to keep >= 2 grid steps so v7x's two TensorCores both get work."""
    divisors = [d for d in range(1, batch + 1) if batch % d == 0]
    return max(divisors,
               key=lambda d: (d * n_points >= 128, batch // d >= 2, -d))


@jax.jit
def pos_extraction(x, *weights):
    B, C, N = x.shape
    bt = _pick_batch_tile(B, N)
    g = B // bt
    m = bt * N

    # Fold `bt` batches onto the point axis: [B,C,N] -> [G, C, bt*N].  This is
    # wrapper-side layout plumbing so every in-kernel matmul and the output store
    # see a >=128-wide lane axis (unmasked vst, fuller MXU lanes).
    x_slab = x.reshape(g, bt, C, N).transpose(0, 2, 1, 3).reshape(g, C, m)

    in_specs = [pl.BlockSpec((1, C, m), lambda i: (i, 0, 0))]
    for w in weights:
        in_specs.append(pl.BlockSpec(w.shape, lambda i, _nd=w.ndim: (0,) * _nd))

    kernel = functools.partial(pos_extraction_kernel, batch_tile=bt, n_points=N)
    out_slab = pl.pallas_call(
        kernel,
        out_shape=jax.ShapeDtypeStruct((g, C, m), x.dtype),
        grid=(g,),
        in_specs=in_specs,
        out_specs=pl.BlockSpec((1, C, m), lambda i: (i, 0, 0)),
        scratch_shapes=[pltpu.VMEM((INNER, m), jnp.float32)],
        compiler_params=pltpu.CompilerParams(
            dimension_semantics=("parallel",)),
    )(x_slab, *weights)

    return out_slab.reshape(g, C, bt, N).transpose(0, 2, 1, 3).reshape(B, C, N)


def pos_extraction_ref(x, w1, bn1s, bn1b, w2, bn2s, bn2b,
                       wqkv, wout, bout, bnos, bnob, wffn, bnfs, bnfb):
    """Pure-JAX reference mirroring the eval-mode PyTorch module."""
    def one(xb):  # [C, N]
        h = jnp.maximum((w1 @ xb) * bn1s + bn1b, 0.0)
        h = (w2 @ h) * bn2s + bn2b
        y = jnp.maximum(h + xb, 0.0)

        qkv = wqkv @ y                                       # [3*INNER, N]
        q = qkv[:INNER].reshape(HEADS, DIM_HEAD, -1)
        k = qkv[INNER:2 * INNER].reshape(HEADS, DIM_HEAD, -1)
        v = qkv[2 * INNER:].reshape(HEADS, DIM_HEAD, -1)
        dots = jnp.einsum('hdi,hdj->hij', q, k) * (DIM_HEAD ** -0.5)
        attn = jax.nn.softmax(dots, axis=-1)
        out = jnp.einsum('hij,hdj->hdi', attn, v).reshape(INNER, -1)
        att = (wout @ out + bout) * bnos + bnob
        att = jnp.maximum(att + y, 0.0)

        ffn = (wffn @ att) * bnfs + bnfb
        return jnp.maximum(att + ffn, 0.0)
    return jax.vmap(one)(x)


def init_params(key, C):
    """Deterministic synthetic params matching PosExtraction(channels=C, blocks=1)."""
    ks = list(jax.random.split(key, 20))
    eps = 1e-5

    def conv_w(k, co, ci, scale=0.1):
        return scale * jax.random.normal(k, (co, ci), jnp.float32)

    def bn_affine(kg, kb):
        # eval-mode BN with running_mean=0, running_var=1 folded to scale/shift
        gamma = 1.0 + 0.1 * jax.random.normal(kg, (C, 1), jnp.float32)
        beta = 0.1 * jax.random.normal(kb, (C, 1), jnp.float32)
        return gamma / jnp.sqrt(1.0 + eps), beta

    w1 = conv_w(ks[0], C, C)
    bn1s, bn1b = bn_affine(ks[1], ks[2])
    w2 = conv_w(ks[3], C, C)
    bn2s, bn2b = bn_affine(ks[4], ks[5])

    wqkv = conv_w(ks[6], 3 * INNER, C)           # Linear(dim, inner*3, bias=False)
    wout = conv_w(ks[7], C, INNER)               # Conv1d(inner, dim, 1) weight
    bout = 0.1 * jax.random.normal(ks[8], (C, 1), jnp.float32)   # its bias
    bnos, bnob = bn_affine(ks[9], ks[10])

    wffn = conv_w(ks[11], C, C)                  # ffn Conv1d(dim, dim, 1, bias=False)
    bnfs, bnfb = bn_affine(ks[12], ks[13])

    return (w1, bn1s, bn1b, w2, bn2s, bn2b,
            wqkv, wout, bout, bnos, bnob,
            wffn, bnfs, bnfb)


if __name__ == "__main__":
    B, C, N = 4, 32, 64  # [b, d, g]; B=4 -> Bt=2 slabs (lane width 128), grid of 2
    key = jax.random.PRNGKey(0)
    kx, kp = jax.random.split(key)
    x = jax.random.normal(kx, (B, C, N), jnp.float32)
    params = init_params(kp, C)

    out = jax.block_until_ready(pos_extraction(x, *params))
    assert out.shape == (B, C, N) and out.dtype == jnp.float32
    assert bool(jnp.all(jnp.isfinite(out)))

    ref = jax.block_until_ready(pos_extraction_ref(x, *params))
    rel_err = float(jnp.max(jnp.abs(out - ref)) / (jnp.max(jnp.abs(ref)) + 1e-6))
    assert rel_err < 5e-2, f"kernel/reference mismatch: rel_err={rel_err}"
    print("KERNEL_OK")
</pallas_src>

<mosaic_0001>
module attributes {stable_mosaic.version = 11 : i64} {
  func.func @pos_extraction_kernel(%arg0: i32, %arg1: memref<1x32x128xf32, #tpu.memory_space<vmem>>, %arg2: memref<32x32xf32, #tpu.memory_space<vmem>>, %arg3: memref<32x1xf32, #tpu.memory_space<vmem>>, %arg4: memref<32x1xf32, #tpu.memory_space<vmem>>, %arg5: memref<32x32xf32, #tpu.memory_space<vmem>>, %arg6: memref<32x1xf32, #tpu.memory_space<vmem>>, %arg7: memref<32x1xf32, #tpu.memory_space<vmem>>, %arg8: memref<384x32xf32, #tpu.memory_space<vmem>>, %arg9: memref<32x128xf32, #tpu.memory_space<vmem>>, %arg10: memref<32x1xf32, #tpu.memory_space<vmem>>, %arg11: memref<32x1xf32, #tpu.memory_space<vmem>>, %arg12: memref<32x1xf32, #tpu.memory_space<vmem>>, %arg13: memref<32x32xf32, #tpu.memory_space<vmem>>, %arg14: memref<32x1xf32, #tpu.memory_space<vmem>>, %arg15: memref<32x1xf32, #tpu.memory_space<vmem>>, %arg16: memref<1x32x128xf32, #tpu.memory_space<vmem>>, %arg17: memref<128x128xf32, #tpu.memory_space<vmem>>) attributes {dimension_semantics = [#tpu.dimension_semantics<parallel>], iteration_bounds = array<i64: 2>, scalar_prefetch = 0 : i64, scratch_operands = 1 : i64, tpu.core_type = #tpu.core_type<tc>, window_params = [{transform_indices = @transform_0, window_bounds = array<i64: 1, 32, 128>}, {pipeline_mode = #tpu.pipeline_mode<synchronous>, transform_indices = @transform_1, window_bounds = array<i64: 32, 32>}, {pipeline_mode = #tpu.pipeline_mode<synchronous>, transform_indices = @transform_2, window_bounds = array<i64: 32, 1>}, {pipeline_mode = #tpu.pipeline_mode<synchronous>, transform_indices = @transform_3, window_bounds = array<i64: 32, 1>}, {pipeline_mode = #tpu.pipeline_mode<synchronous>, transform_indices = @transform_4, window_bounds = array<i64: 32, 32>}, {pipeline_mode = #tpu.pipeline_mode<synchronous>, transform_indices = @transform_5, window_bounds = array<i64: 32, 1>}, {pipeline_mode = #tpu.pipeline_mode<synchronous>, transform_indices = @transform_6, window_bounds = array<i64: 32, 1>}, {pipeline_mode = #tpu.pipeline_mode<synchronous>, transform_indices = @transform_7, window_bounds = array<i64: 384, 32>}, {pipeline_mode = #tpu.pipeline_mode<synchronous>, transform_indices = @transform_8, window_bounds = array<i64: 32, 128>}, {pipeline_mode = #tpu.pipeline_mode<synchronous>, transform_indices = @transform_9, window_bounds = array<i64: 32, 1>}, {pipeline_mode = #tpu.pipeline_mode<synchronous>, transform_indices = @transform_10, window_bounds = array<i64: 32, 1>}, {pipeline_mode = #tpu.pipeline_mode<synchronous>, transform_indices = @transform_11, window_bounds = array<i64: 32, 1>}, {pipeline_mode = #tpu.pipeline_mode<synchronous>, transform_indices = @transform_12, window_bounds = array<i64: 32, 32>}, {pipeline_mode = #tpu.pipeline_mode<synchronous>, transform_indices = @transform_13, window_bounds = array<i64: 32, 1>}, {pipeline_mode = #tpu.pipeline_mode<synchronous>, transform_indices = @transform_14, window_bounds = array<i64: 32, 1>}, {transform_indices = @transform_15, window_bounds = array<i64: 1, 32, 128>}]} {
    %c0 = arith.constant 0 : index
    %c0_0 = arith.constant 0 : index
    %c0_1 = arith.constant 0 : index
    %0 = vector.load %arg1[%c0, %c0_0, %c0_1] : memref<1x32x128xf32, #tpu.memory_space<vmem>>, vector<1x32x128xf32>
    %1 = vector.shape_cast %0 : vector<1x32x128xf32> to vector<32x128xf32>
    %c0_2 = arith.constant 0 : index
    %c0_3 = arith.constant 0 : index
    %2 = vector.load %arg2[%c0_2, %c0_3] : memref<32x32xf32, #tpu.memory_space<vmem>>, vector<32x32xf32>
    %cst = arith.constant dense<0.000000e+00> : vector<32x128xf32>
    %3 = tpu.matmul %2, %1, %cst {dimension_numbers = #tpu.dot_dimension_numbers<[1], [0], [0], [1], [0, 0, 1, 1], [], []>} : vector<32x32xf32>, vector<32x128xf32>, vector<32x128xf32> -> vector<32x128xf32>
    %c0_4 = arith.constant 0 : index
    %c0_5 = arith.constant 0 : index
    %4 = vector.load %arg3[%c0_4, %c0_5] : memref<32x1xf32, #tpu.memory_space<vmem>>, vector<32x1xf32>
    %5 = vector.broadcast %4 : vector<32x1xf32> to vector<32x128xf32>
    %6 = arith.mulf %3, %5 : vector<32x128xf32>
    %c0_6 = arith.constant 0 : index
    %c0_7 = arith.constant 0 : index
    %7 = vector.load %arg4[%c0_6, %c0_7] : memref<32x1xf32, #tpu.memory_space<vmem>>, vector<32x1xf32>
    %8 = vector.broadcast %7 : vector<32x1xf32> to vector<32x128xf32>
    %9 = arith.addf %6, %8 : vector<32x128xf32>
    %cst_8 = arith.constant 0.000000e+00 : f32
    %10 = vector.broadcast %cst_8 : f32 to vector<32x128xf32>
    %11 = arith.maximumf %9, %10 : vector<32x128xf32>
    %c0_9 = arith.constant 0 : index
    %c0_10 = arith.constant 0 : index
    %12 = vector.load %arg5[%c0_9, %c0_10] : memref<32x32xf32, #tpu.memory_space<vmem>>, vector<32x32xf32>
    %cst_11 = arith.constant dense<0.000000e+00> : vector<32x128xf32>
    %13 = tpu.matmul %12, %11, %cst_11 {dimension_numbers = #tpu.dot_dimension_numbers<[1], [0], [0], [1], [0, 0, 1, 1], [], []>} : vector<32x32xf32>, vector<32x128xf32>, vector<32x128xf32> -> vector<32x128xf32>
    %c0_12 = arith.constant 0 : index
    %c0_13 = arith.constant 0 : index
    %14 = vector.load %arg6[%c0_12, %c0_13] : memref<32x1xf32, #tpu.memory_space<vmem>>, vector<32x1xf32>
    %15 = vector.broadcast %14 : vector<32x1xf32> to vector<32x128xf32>
    %16 = arith.mulf %13, %15 : vector<32x128xf32>
    %c0_14 = arith.constant 0 : index
    %c0_15 = arith.constant 0 : index
    %17 = vector.load %arg7[%c0_14, %c0_15] : memref<32x1xf32, #tpu.memory_space<vmem>>, vector<32x1xf32>
    %18 = vector.broadcast %17 : vector<32x1xf32> to vector<32x128xf32>
    %19 = arith.addf %16, %18 : vector<32x128xf32>
    %20 = arith.addf %19, %1 : vector<32x128xf32>
    %cst_16 = arith.constant 0.000000e+00 : f32
    %21 = vector.broadcast %cst_16 : f32 to vector<32x128xf32>
    %22 = arith.maximumf %20, %21 : vector<32x128xf32>
    %c0_17 = arith.constant 0 : index
    %c0_18 = arith.constant 0 : index
    %23 = vector.load %arg8[%c0_17, %c0_18] : memref<384x32xf32, #tpu.memory_space<vmem>>, vector<384x32xf32>
    %cst_19 = arith.constant dense<0.000000e+00> : vector<384x128xf32>
    %24 = tpu.matmul %23, %22, %cst_19 {dimension_numbers = #tpu.dot_dimension_numbers<[1], [0], [0], [1], [0, 0, 1, 1], [], []>} : vector<384x32xf32>, vector<32x128xf32>, vector<384x128xf32> -> vector<384x128xf32>
    %25 = tpu.iota {dimensions = array<i32: 0>} : vector<128x128xi32>
    %26 = tpu.iota {dimensions = array<i32: 1>} : vector<128x128xi32>
    %false = arith.constant false
    %27 = vector.broadcast %false : i1 to vector<128x128xi1>
    %c0_i32 = arith.constant 0 : i32
    %28 = vector.broadcast %c0_i32 : i32 to vector<128x128xi32>
    %29 = arith.cmpi sge, %25, %28 : vector<128x128xi32>
    %c64_i32 = arith.constant 64 : i32
    %30 = vector.broadcast %c64_i32 : i32 to vector<128x128xi32>
    %31 = arith.cmpi slt, %25, %30 : vector<128x128xi32>
    %32 = arith.andi %29, %31 : vector<128x128xi1>
    %c0_i32_20 = arith.constant 0 : i32
    %33 = vector.broadcast %c0_i32_20 : i32 to vector<128x128xi32>
    %34 = arith.cmpi sge, %26, %33 : vector<128x128xi32>
    %35 = arith.andi %32, %34 : vector<128x128xi1>
    %c64_i32_21 = arith.constant 64 : i32
    %36 = vector.broadcast %c64_i32_21 : i32 to vector<128x128xi32>
    %37 = arith.cmpi slt, %26, %36 : vector<128x128xi32>
    %38 = arith.andi %35, %37 : vector<128x128xi1>
    %39 = arith.ori %27, %38 : vector<128x128xi1>
    %c64_i32_22 = arith.constant 64 : i32
    %40 = vector.broadcast %c64_i32_22 : i32 to vector<128x128xi32>
    %41 = arith.cmpi sge, %25, %40 : vector<128x128xi32>
    %c128_i32 = arith.constant 128 : i32
    %42 = vector.broadcast %c128_i32 : i32 to vector<128x128xi32>
    %43 = arith.cmpi slt, %25, %42 : vector<128x128xi32>
    %44 = arith.andi %41, %43 : vector<128x128xi1>
    %c64_i32_23 = arith.constant 64 : i32
    %45 = vector.broadcast %c64_i32_23 : i32 to vector<128x128xi32>
    %46 = arith.cmpi sge, %26, %45 : vector<128x128xi32>
    %47 = arith.andi %44, %46 : vector<128x128xi1>
    %c128_i32_24 = arith.constant 128 : i32
    %48 = vector.broadcast %c128_i32_24 : i32 to vector<128x128xi32>
    %49 = arith.cmpi slt, %26, %48 : vector<128x128xi32>
    %50 = arith.andi %47, %49 : vector<128x128xi1>
    %51 = arith.ori %39, %50 : vector<128x128xi1>
    %cst_25 = arith.constant 0.000000e+00 : f32
    %cst_26 = arith.constant -1.000000e+30 : f32
    %52 = vector.broadcast %cst_25 : f32 to vector<128x128xf32>
    %53 = vector.broadcast %cst_26 : f32 to vector<128x128xf32>
    %54 = arith.select %51, %52, %53 : vector<128x128xi1>, vector<128x128xf32>
    %55 = vector.extract_strided_slice %24 {offsets = [0, 0], sizes = [32, 128], strides = [1, 1]} : vector<384x128xf32> to vector<32x128xf32>
    %56 = vector.extract_strided_slice %24 {offsets = [128, 0], sizes = [32, 128], strides = [1, 1]} : vector<384x128xf32> to vector<32x128xf32>
    %57 = vector.extract_strided_slice %24 {offsets = [256, 0], sizes = [32, 128], strides = [1, 1]} : vector<384x128xf32> to vector<32x128xf32>
    %cst_27 = arith.constant dense<0.000000e+00> : vector<128x128xf32>
    %58 = tpu.matmul %55, %56, %cst_27 {dimension_numbers = #tpu.dot_dimension_numbers<[0], [0], [1], [1], [0, 1, 1, 1], [], []>} : vector<32x128xf32>, vector<32x128xf32>, vector<128x128xf32> -> vector<128x128xf32>
    %cst_28 = arith.constant 0.176776692 : f32
    %59 = vector.broadcast %cst_28 : f32 to vector<128x128xf32>
    %60 = arith.mulf %58, %59 : vector<128x128xf32>
    %61 = arith.addf %60, %54 : vector<128x128xf32>
    %cst_29 = arith.constant dense<0xFF800000> : vector<128xf32>
    %62 = vector.multi_reduction <maximumf>, %61, %cst_29 [1] : vector<128x128xf32> to vector<128xf32>
    %63 = vector.shape_cast %62 : vector<128xf32> to vector<128x1xf32>
    %64 = vector.broadcast %63 : vector<128x1xf32> to vector<128x128xf32>
    %65 = arith.subf %61, %64 : vector<128x128xf32>
    %66 = math.exp %65 : vector<128x128xf32>
    %cst_30 = arith.constant dense<0.000000e+00> : vector<128xf32>
    %67 = vector.multi_reduction <add>, %66, %cst_30 [1] : vector<128x128xf32> to vector<128xf32>
    %68 = vector.shape_cast %67 : vector<128xf32> to vector<128x1xf32>
    %69 = tpu.reciprocal %68 {approx = true} : vector<128x1xf32> -> vector<128x1xf32>
    %70 = vector.broadcast %69 : vector<128x1xf32> to vector<128x128xf32>
    %71 = arith.mulf %66, %70 : vector<128x128xf32>
    %cst_31 = arith.constant dense<0.000000e+00> : vector<32x128xf32>
    %72 = tpu.matmul %57, %71, %cst_31 {dimension_numbers = #tpu.dot_dimension_numbers<[1], [1], [0], [0], [0, 0, 1, 0], [], []>} : vector<32x128xf32>, vector<128x128xf32>, vector<32x128xf32> -> vector<32x128xf32>
    %c0_32 = arith.constant 0 : index
    %c0_33 = arith.constant 0 : index
    %73 = vector.load %arg17[%c0_32, %c0_33] : memref<128x128xf32, #tpu.memory_space<vmem>>, vector<32x128xf32>
    tpu.vector_store %arg17[%c0_32, %c0_33], %72 {strides = array<i32>} : memref<128x128xf32, #tpu.memory_space<vmem>>, vector<32x128xf32>,
    %74 = vector.extract_strided_slice %24 {offsets = [32, 0], sizes = [32, 128], strides = [1, 1]} : vector<384x128xf32> to vector<32x128xf32>
    %75 = vector.extract_strided_slice %24 {offsets = [160, 0], sizes = [32, 128], strides = [1, 1]} : vector<384x128xf32> to vector<32x128xf32>
    %76 = vector.extract_strided_slice %24 {offsets = [288, 0], sizes = [32, 128], strides = [1, 1]} : vector<384x128xf32> to vector<32x128xf32>
    %cst_34 = arith.constant dense<0.000000e+00> : vector<128x128xf32>
    %77 = tpu.matmul %74, %75, %cst_34 {dimension_numbers = #tpu.dot_dimension_numbers<[0], [0], [1], [1], [0, 1, 1, 1], [], []>} : vector<32x128xf32>, vector<32x128xf32>, vector<128x128xf32> -> vector<128x128xf32>
    %cst_35 = arith.constant 0.176776692 : f32
    %78 = vector.broadcast %cst_35 : f32 to vector<128x128xf32>
    %79 = arith.mulf %77, %78 : vector<128x128xf32>
    %80 = arith.addf %79, %54 : vector<128x128xf32>
    %cst_36 = arith.constant dense<0xFF800000> : vector<128xf32>
    %81 = vector.multi_reduction <maximumf>, %80, %cst_36 [1] : vector<128x128xf32> to vector<128xf32>
    %82 = vector.shape_cast %81 : vector<128xf32> to vector<128x1xf32>
    %83 = vector.broadcast %82 : vector<128x1xf32> to vector<128x128xf32>
    %84 = arith.subf %80, %83 : vector<128x128xf32>
    %85 = math.exp %84 : vector<128x128xf32>
    %cst_37 = arith.constant dense<0.000000e+00> : vector<128xf32>
    %86 = vector.multi_reduction <add>, %85, %cst_37 [1] : vector<128x128xf32> to vector<128xf32>
    %87 = vector.shape_cast %86 : vector<128xf32> to vector<128x1xf32>
    %88 = tpu.reciprocal %87 {approx = true} : vector<128x1xf32> -> vector<128x1xf32>
    %89 = vector.broadcast %88 : vector<128x1xf32> to vector<128x128xf32>
    %90 = arith.mulf %85, %89 : vector<128x128xf32>
    %cst_38 = arith.constant dense<0.000000e+00> : vector<32x128xf32>
    %91 = tpu.matmul %76, %90, %cst_38 {dimension_numbers = #tpu.dot_dimension_numbers<[1], [1], [0], [0], [0, 0, 1, 0], [], []>} : vector<32x128xf32>, vector<128x128xf32>, vector<32x128xf32> -> vector<32x128xf32>
    %c32 = arith.constant 32 : index
    %c0_39 = arith.constant 0 : index
    %92 = vector.load %arg17[%c32, %c0_39] : memref<128x128xf32, #tpu.memory_space<vmem>>, vector<32x128xf32>
    tpu.vector_store %arg17[%c32, %c0_39], %91 {strides = array<i32>} : memref<128x128xf32, #tpu.memory_space<vmem>>, vector<32x128xf32>,
    %93 = vector.extract_strided_slice %24 {offsets = [64, 0], sizes = [32, 128], strides = [1, 1]} : vector<384x128xf32> to vector<32x128xf32>
    %94 = vector.extract_strided_slice %24 {offsets = [192, 0], sizes = [32, 128], strides = [1, 1]} : vector<384x128xf32> to vector<32x128xf32>
    %95 = vector.extract_strided_slice %24 {offsets = [320, 0], sizes = [32, 128], strides = [1, 1]} : vector<384x128xf32> to vector<32x128xf32>
    %cst_40 = arith.constant dense<0.000000e+00> : vector<128x128xf32>
    %96 = tpu.matmul %93, %94, %cst_40 {dimension_numbers = #tpu.dot_dimension_numbers<[0], [0], [1], [1], [0, 1, 1, 1], [], []>} : vector<32x128xf32>, vector<32x128xf32>, vector<128x128xf32> -> vector<128x128xf32>
    %cst_41 = arith.constant 0.176776692 : f32
    %97 = vector.broadcast %cst_41 : f32 to vector<128x128xf32>
    %98 = arith.mulf %96, %97 : vector<128x128xf32>
    %99 = arith.addf %98, %54 : vector<128x128xf32>
    %cst_42 = arith.constant dense<0xFF800000> : vector<128xf32>
    %100 = vector.multi_reduction <maximumf>, %99, %cst_42 [1] : vector<128x128xf32> to vector<128xf32>
    %101 = vector.shape_cast %100 : vector<128xf32> to vector<128x1xf32>
    %102 = vector.broadcast %101 : vector<128x1xf32> to vector<128x128xf32>
    %103 = arith.subf %99, %102 : vector<128x128xf32>
    %104 = math.exp %103 : vector<128x128xf32>
    %cst_43 = arith.constant dense<0.000000e+00> : vector<128xf32>
    %105 = vector.multi_reduction <add>, %104, %cst_43 [1] : vector<128x128xf32> to vector<128xf32>
    %106 = vector.shape_cast %105 : vector<128xf32> to vector<128x1xf32>
    %107 = tpu.reciprocal %106 {approx = true} : vector<128x1xf32> -> vector<128x1xf32>
    %108 = vector.broadcast %107 : vector<128x1xf32> to vector<128x128xf32>
    %109 = arith.mulf %104, %108 : vector<128x128xf32>
    %cst_44 = arith.constant dense<0.000000e+00> : vector<32x128xf32>
    %110 = tpu.matmul %95, %109, %cst_44 {dimension_numbers = #tpu.dot_dimension_numbers<[1], [1], [0], [0], [0, 0, 1, 0], [], []>} : vector<32x128xf32>, vector<128x128xf32>, vector<32x128xf32> -> vector<32x128xf32>
    %c64 = arith.constant 64 : index
    %c0_45 = arith.constant 0 : index
    %111 = vector.load %arg17[%c64, %c0_45] : memref<128x128xf32, #tpu.memory_space<vmem>>, vector<32x128xf32>
    tpu.vector_store %arg17[%c64, %c0_45], %110 {strides = array<i32>} : memref<128x128xf32, #tpu.memory_space<vmem>>, vector<32x128xf32>,
    %112 = vector.extract_strided_slice %24 {offsets = [96, 0], sizes = [32, 128], strides = [1, 1]} : vector<384x128xf32> to vector<32x128xf32>
    %113 = vector.extract_strided_slice %24 {offsets = [224, 0], sizes = [32, 128], strides = [1, 1]} : vector<384x128xf32> to vector<32x128xf32>
    %114 = vector.extract_strided_slice %24 {offsets = [352, 0], sizes = [32, 128], strides = [1, 1]} : vector<384x128xf32> to vector<32x128xf32>
    %cst_46 = arith.constant dense<0.000000e+00> : vector<128x128xf32>
    %115 = tpu.matmul %112, %113, %cst_46 {dimension_numbers = #tpu.dot_dimension_numbers<[0], [0], [1], [1], [0, 1, 1, 1], [], []>} : vector<32x128xf32>, vector<32x128xf32>, vector<128x128xf32> -> vector<128x128xf32>
    %cst_47 = arith.constant 0.176776692 : f32
    %116 = vector.broadcast %cst_47 : f32 to vector<128x128xf32>
    %117 = arith.mulf %115, %116 : vector<128x128xf32>
    %118 = arith.addf %117, %54 : vector<128x128xf32>
    %cst_48 = arith.constant dense<0xFF800000> : vector<128xf32>
    %119 = vector.multi_reduction <maximumf>, %118, %cst_48 [1] : vector<128x128xf32> to vector<128xf32>
    %120 = vector.shape_cast %119 : vector<128xf32> to vector<128x1xf32>
    %121 = vector.broadcast %120 : vector<128x1xf32> to vector<128x128xf32>
    %122 = arith.subf %118, %121 : vector<128x128xf32>
    %123 = math.exp %122 : vector<128x128xf32>
    %cst_49 = arith.constant dense<0.000000e+00> : vector<128xf32>
    %124 = vector.multi_reduction <add>, %123, %cst_49 [1] : vector<128x128xf32> to vector<128xf32>
    %125 = vector.shape_cast %124 : vector<128xf32> to vector<128x1xf32>
    %126 = tpu.reciprocal %125 {approx = true} : vector<128x1xf32> -> vector<128x1xf32>
    %127 = vector.broadcast %126 : vector<128x1xf32> to vector<128x128xf32>
    %128 = arith.mulf %123, %127 : vector<128x128xf32>
    %cst_50 = arith.constant dense<0.000000e+00> : vector<32x128xf32>
    %129 = tpu.matmul %114, %128, %cst_50 {dimension_numbers = #tpu.dot_dimension_numbers<[1], [1], [0], [0], [0, 0, 1, 0], [], []>} : vector<32x128xf32>, vector<128x128xf32>, vector<32x128xf32> -> vector<32x128xf32>
    %c96 = arith.constant 96 : index
    %c0_51 = arith.constant 0 : index
    %130 = vector.load %arg17[%c96, %c0_51] : memref<128x128xf32, #tpu.memory_space<vmem>>, vector<32x128xf32>
    tpu.vector_store %arg17[%c96, %c0_51], %129 {strides = array<i32>} : memref<128x128xf32, #tpu.memory_space<vmem>>, vector<32x128xf32>,
    %c0_52 = arith.constant 0 : index
    %c0_53 = arith.constant 0 : index
    %131 = vector.load %arg9[%c0_52, %c0_53] : memref<32x128xf32, #tpu.memory_space<vmem>>, vector<32x128xf32>
    %c0_54 = arith.constant 0 : index
    %c0_55 = arith.constant 0 : index
    %132 = vector.load %arg17[%c0_54, %c0_55] : memref<128x128xf32, #tpu.memory_space<vmem>>, vector<128x128xf32>
    %cst_56 = arith.constant dense<0.000000e+00> : vector<32x128xf32>
    %133 = tpu.matmul %131, %132, %cst_56 {dimension_numbers = #tpu.dot_dimension_numbers<[1], [0], [0], [1], [0, 0, 1, 1], [], []>} : vector<32x128xf32>, vector<128x128xf32>, vector<32x128xf32> -> vector<32x128xf32>
    %c0_57 = arith.constant 0 : index
    %c0_58 = arith.constant 0 : index
    %134 = vector.load %arg10[%c0_57, %c0_58] : memref<32x1xf32, #tpu.memory_space<vmem>>, vector<32x1xf32>
    %135 = vector.broadcast %134 : vector<32x1xf32> to vector<32x128xf32>
    %136 = arith.addf %133, %135 : vector<32x128xf32>
    %c0_59 = arith.constant 0 : index
    %c0_60 = arith.constant 0 : index
    %137 = vector.load %arg11[%c0_59, %c0_60] : memref<32x1xf32, #tpu.memory_space<vmem>>, vector<32x1xf32>
    %138 = vector.broadcast %137 : vector<32x1xf32> to vector<32x128xf32>
    %139 = arith.mulf %136, %138 : vector<32x128xf32>
    %c0_61 = arith.constant 0 : index
    %c0_62 = arith.constant 0 : index
    %140 = vector.load %arg12[%c0_61, %c0_62] : memref<32x1xf32, #tpu.memory_space<vmem>>, vector<32x1xf32>
    %141 = vector.broadcast %140 : vector<32x1xf32> to vector<32x128xf32>
    %142 = arith.addf %139, %141 : vector<32x128xf32>
    %143 = arith.addf %142, %22 : vector<32x128xf32>
    %cst_63 = arith.constant 0.000000e+00 : f32
    %144 = vector.broadcast %cst_63 : f32 to vector<32x128xf32>
    %145 = arith.maximumf %143, %144 : vector<32x128xf32>
    %c0_64 = arith.constant 0 : index
    %c0_65 = arith.constant 0 : index
    %146 = vector.load %arg13[%c0_64, %c0_65] : memref<32x32xf32, #tpu.memory_space<vmem>>, vector<32x32xf32>
    %cst_66 = arith.constant dense<0.000000e+00> : vector<32x128xf32>
    %147 = tpu.matmul %146, %145, %cst_66 {dimension_numbers = #tpu.dot_dimension_numbers<[1], [0], [0], [1], [0, 0, 1, 1], [], []>} : vector<32x32xf32>, vector<32x128xf32>, vector<32x128xf32> -> vector<32x128xf32>
    %c0_67 = arith.constant 0 : index
    %c0_68 = arith.constant 0 : index
    %148 = vector.load %arg14[%c0_67, %c0_68] : memref<32x1xf32, #tpu.memory_space<vmem>>, vector<32x1xf32>
    %149 = vector.broadcast %148 : vector<32x1xf32> to vector<32x128xf32>
    %150 = arith.mulf %147, %149 : vector<32x128xf32>
    %c0_69 = arith.constant 0 : index
    %c0_70 = arith.constant 0 : index
    %151 = vector.load %arg15[%c0_69, %c0_70] : memref<32x1xf32, #tpu.memory_space<vmem>>, vector<32x1xf32>
    %152 = vector.broadcast %151 : vector<32x1xf32> to vector<32x128xf32>
    %153 = arith.addf %150, %152 : vector<32x128xf32>
    %154 = arith.addf %145, %153 : vector<32x128xf32>
    %cst_71 = arith.constant 0.000000e+00 : f32
    %155 = vector.broadcast %cst_71 : f32 to vector<32x128xf32>
    %156 = arith.maximumf %154, %155 : vector<32x128xf32>
    %c0_72 = arith.constant 0 : index
    %c0_73 = arith.constant 0 : index
    %c0_74 = arith.constant 0 : index
    %157 = vector.load %arg16[%c0_72, %c0_73, %c0_74] : memref<1x32x128xf32, #tpu.memory_space<vmem>>, vector<1x32x128xf32>
    %158 = vector.shape_cast %157 : vector<1x32x128xf32> to vector<32x128xf32>
    %159 = vector.shape_cast %156 : vector<32x128xf32> to vector<1x32x128xf32>
    tpu.vector_store %arg16[%c0_72, %c0_73, %c0_74], %159 {strides = array<i32>} : memref<1x32x128xf32, #tpu.memory_space<vmem>>, vector<1x32x128xf32>,
    return
  }
  func.func @transform_0(%arg0: i32) -> (i32, i32, i32) {
    %c0_i32 = arith.constant 0 : i32
    %c0_i32_0 = arith.constant 0 : i32
    %c0_i32_1 = arith.constant 0 : i32
    return %arg0, %c0_i32, %c0_i32_0 : i32, i32, i32
  }
  func.func @transform_1(%arg0: i32) -> (i32, i32) {
    %c0_i32 = arith.constant 0 : i32
    %c0_i32_0 = arith.constant 0 : i32
    %c0_i32_1 = arith.constant 0 : i32
    return %c0_i32, %c0_i32_0 : i32, i32
  }
  func.func @transform_2(%arg0: i32) -> (i32, i32) {
    %c0_i32 = arith.constant 0 : i32
    %c0_i32_0 = arith.constant 0 : i32
    %c0_i32_1 = arith.constant 0 : i32
    return %c0_i32, %c0_i32_0 : i32, i32
  }
  func.func @transform_3(%arg0: i32) -> (i32, i32) {
    %c0_i32 = arith.constant 0 : i32
    %c0_i32_0 = arith.constant 0 : i32
    %c0_i32_1 = arith.constant 0 : i32
    return %c0_i32, %c0_i32_0 : i32, i32
  }
  func.func @transform_4(%arg0: i32) -> (i32, i32) {
    %c0_i32 = arith.constant 0 : i32
    %c0_i32_0 = arith.constant 0 : i32
    %c0_i32_1 = arith.constant 0 : i32
    return %c0_i32, %c0_i32_0 : i32, i32
  }
  func.func @transform_5(%arg0: i32) -> (i32, i32) {
    %c0_i32 = arith.constant 0 : i32
    %c0_i32_0 = arith.constant 0 : i32
    %c0_i32_1 = arith.constant 0 : i32
    return %c0_i32, %c0_i32_0 : i32, i32
  }
  func.func @transform_6(%arg0: i32) -> (i32, i32) {
    %c0_i32 = arith.constant 0 : i32
    %c0_i32_0 = arith.constant 0 : i32
    %c0_i32_1 = arith.constant 0 : i32
    return %c0_i32, %c0_i32_0 : i32, i32
  }
  func.func @transform_7(%arg0: i32) -> (i32, i32) {
    %c0_i32 = arith.constant 0 : i32
    %c0_i32_0 = arith.constant 0 : i32
    %c0_i32_1 = arith.constant 0 : i32
    return %c0_i32, %c0_i32_0 : i32, i32
  }
  func.func @transform_8(%arg0: i32) -> (i32, i32) {
    %c0_i32 = arith.constant 0 : i32
    %c0_i32_0 = arith.constant 0 : i32
    %c0_i32_1 = arith.constant 0 : i32
    return %c0_i32, %c0_i32_0 : i32, i32
  }
  func.func @transform_9(%arg0: i32) -> (i32, i32) {
    %c0_i32 = arith.constant 0 : i32
    %c0_i32_0 = arith.constant 0 : i32
    %c0_i32_1 = arith.constant 0 : i32
    return %c0_i32, %c0_i32_0 : i32, i32
  }
  func.func @transform_10(%arg0: i32) -> (i32, i32) {
    %c0_i32 = arith.constant 0 : i32
    %c0_i32_0 = arith.constant 0 : i32
    %c0_i32_1 = arith.constant 0 : i32
    return %c0_i32, %c0_i32_0 : i32, i32
  }
  func.func @transform_11(%arg0: i32) -> (i32, i32) {
    %c0_i32 = arith.constant 0 : i32
    %c0_i32_0 = arith.constant 0 : i32
    %c0_i32_1 = arith.constant 0 : i32
    return %c0_i32, %c0_i32_0 : i32, i32
  }
  func.func @transform_12(%arg0: i32) -> (i32, i32) {
    %c0_i32 = arith.constant 0 : i32
    %c0_i32_0 = arith.constant 0 : i32
    %c0_i32_1 = arith.constant 0 : i32
    return %c0_i32, %c0_i32_0 : i32, i32
  }
  func.func @transform_13(%arg0: i32) -> (i32, i32) {
    %c0_i32 = arith.constant 0 : i32
    %c0_i32_0 = arith.constant 0 : i32
    %c0_i32_1 = arith.constant 0 : i32
    return %c0_i32, %c0_i32_0 : i32, i32
  }
  func.func @transform_14(%arg0: i32) -> (i32, i32) {
    %c0_i32 = arith.constant 0 : i32
    %c0_i32_0 = arith.constant 0 : i32
    %c0_i32_1 = arith.constant 0 : i32
    return %c0_i32, %c0_i32_0 : i32, i32
  }
  func.func @transform_15(%arg0: i32) -> (i32, i32, i32) {
    %c0_i32 = arith.constant 0 : i32
    %c0_i32_0 = arith.constant 0 : i32
    %c0_i32_1 = arith.constant 0 : i32
    return %arg0, %c0_i32, %c0_i32_0 : i32, i32, i32
  }
}

</mosaic_0001>

<bundles_post_ra>
// kernel: pos_extraction.1
= control target key start
LH: loop header
LB: loop body
LE: loop exit
PB: predicated region body
PF: predicated region fallthrough
CT: control target
= control target key end

     0   :  { %s3508_s18 = smov 0   ;;  %s4741_s0 = inlined_call_operand.vmem [shape: f32[2,32,128], index: 0, kind: input, shape index: {}]   ;;  %s4742_s1 = inlined_call_operand.vmem [shape: f32[32,32], index: 1, kind: input, shape index: {}]   ;;  %s4743_s2 = inlined_call_operand.vmem [shape: f32[32,1], index: 2, kind: input, shape index: {}]   ;;  %s4744_s3 = inlined_call_operand.vmem [shape: f32[32,1], index: 3, kind: input, shape index: {}]   ;;  %s4745_s4 = inlined_call_operand.vmem [shape: f32[32,32], index: 4, kind: input, shape index: {}]   ;;  %s4746_s5 = inlined_call_operand.vmem [shape: f32[32,1], index: 5, kind: input, shape index: {}]   ;;  %s4747_s6 = inlined_call_operand.vmem [shape: f32[32,1], index: 6, kind: input, shape index: {}]   ;;  %s4748_s7 = inlined_call_operand.vmem [shape: f32[384,32], index: 7, kind: input, shape index: {}]   ;;  %s4749_s8 = inlined_call_operand.vmem [shape: f32[32,128], index: 8, kind: input, shape index: {}]   ;;  %s4750_s9 = inlined_call_operand.vmem [shape: f32[32,1], index: 9, kind: input, shape index: {}]   ;;  %s4751_s10 = inlined_call_operand.vmem [shape: f32[32,1], index: 10, kind: input, shape index: {}]   ;;  %s4752_s11 = inlined_call_operand.vmem [shape: f32[32,1], index: 11, kind: input, shape index: {}]   ;;  %s4753_s12 = inlined_call_operand.vmem [shape: f32[32,32], index: 12, kind: input, shape index: {}]   ;;  %s4754_s13 = inlined_call_operand.vmem [shape: f32[32,1], index: 13, kind: input, shape index: {}]   ;;  %s4755_s14 = inlined_call_operand.vmem [shape: f32[32,1], index: 14, kind: input, shape index: {}]   ;;  %s4756_s15 = inlined_call_operand.vmem [shape: f32[2,32,128], index: 15, kind: output, shape index: {}]  }
   0x1 LB: > { %s3003_s19 = sadd.s32 4294967295, %s3424_s18   ;;  %p3007_p0 = scmp.ge.s32.totalorder %s3424_s18, 1  ;;  %s3424_s18 = sphi %s3508_s18, %s25_s18  }
   0x2   : > { %p437_p1 = scmp.lt.s32.totalorder %s3424_s18, 3 }
   0x4   : > { %p438_p2 = pnand %p3007_p0, %p437_p1 }
   0x6   : > { %441 = sbr.rel (%p438_p2) target bundleno = 2862 (0xb2e), region = 80 }
   0xb   : > { %v576_v0 = vld [vmem:[%s4744_s3 + $0x18] sm:$0xff]  ;;  %p485_p3 = scmp.lt.s32.totalorder %s3003_s19, 1  ;;  %v3426_v2 = vmov 0   ;;  %v575_v3 = vld [vmem:[%s4744_s3 + $0x10] sm:$0xff]  ;;  %v546_v7 = vld [vmem:[%s4743_s2 + $0x8] sm:$0xff]  ;;  %vm503_vm0 = vcmask 261120  }
   0xc   : > { %v548_v1 = vld [vmem:[%s4743_s2 + $0x18] sm:$0xff]  ;;  %3160 = vset.pattern.permute.xlu1 %v3426_v2  ;;  %3159 = vset.pattern.permute.xlu0 %v3426_v2  ;;  %v547_v6 = vld [vmem:[%s4743_s2 + $0x10] sm:$0xff]  ;;  %v499_v10 = vld [vmem:[%s4742_s1] sm:$0xff] }
   0xd   : > { %594 = vperm.xlu1 %3160, %v576_v0   ;;  %566 = vperm.xlu0 %3159, %v548_v1   ;;  %s4764_s19 = smov (!%p485_p3, %s3003_s19), 1  ;;  %v501_v11 = vld [vmem:[%s4742_s1 + $0x10] sm:$0xff]  ;;  %v545_v12 = vld [vmem:[%s4743_s2] sm:$0xff]  ;;  %v574_v13 = vld [vmem:[%s4744_s3 + $0x8] sm:$0xff] }
   0xe   : > { %3161 = vset.pattern.permute.xlu2 %v3426_v2  ;;  %s3138_s24 = sshll.u32 %s4764_s19, 5  ;;  %v573_v14 = vld [vmem:[%s4744_s3] sm:$0xff]  ;;  %v500_v15 = vld [vmem:[%s4742_s1 + $0x8] sm:$0xff]  ;;  %v502_v16 = vld [vmem:[%s4742_s1 + $0x18] sm:$0xff] }
   0xf   : > { %s489_s29 = scalar_lea.vmem %s4741_s0, %s3138_s24  ;;  %589 = vperm.xlu2 %3161, %v575_v3   ;;  %v653_v17 = vld [vmem:[%s4746_s5 + $0x18] sm:$0xff]  ;;  %v652_v18 = vld [vmem:[%s4746_s5 + $0x10] sm:$0xff]  ;;  %v651_v20 = vld [vmem:[%s4746_s5 + $0x8] sm:$0xff]  ;;  %s494_s21 = scalar_lea.vmem %s4756_s15, %s3138_s24 }
  0x10   : > { %v3533_v4 = vld [vmem:[%s489_s29 + $0x18] sm:$0xff]  ;;  %v3535_v5 = vld [vmem:[%s489_s29 + $0x10] sm:$0xff]  ;;  %v3545_v8 = vld [vmem:[%s489_s29 + $0x8] sm:$0xff] }
  0x11   : > { %528 = vmatpush.msra.mxu1 %v3533_v4  ;;  %3140 = vmatpush.msra.mxu3 %v3533_v4  ;;  %v3549_v9 = vld [vmem:[%s489_s29] sm:$0xff]  ;;  %v681_v19 = vld [vmem:[%s4747_s6 + $0x18] sm:$0xff]  ;;  %v680_v21 = vld [vmem:[%s4747_s6 + $0x10] sm:$0xff] }
  0x12   : > { %v650_v22 = vld [vmem:[%s4746_s5] sm:$0xff]  ;;  %v679_v23 = vld [vmem:[%s4747_s6 + $0x8] sm:$0xff]  ;;  %v607_v51 = vld [vmem:[%s4745_s4 + $0x10] sm:$0xff] }
  0x13   : > { %529 = vmatpush.msra.mxu1 %v3535_v5  ;;  %3141 = vmatpush.msra.mxu3 %v3535_v5  ;;  %v678_v24 = vld [vmem:[%s4747_s6] sm:$0xff]  ;;  %v606_v50 = vld [vmem:[%s4745_s4 + $0x8] sm:$0xff]  ;;  %v608_v52 = vld [vmem:[%s4745_s4 + $0x18] sm:$0xff] }
  0x14   : > { %v605_v49 = vld [vmem:[%s4745_s4] sm:$0xff] }
  0x15   : > { %561 = vperm.xlu0 %3159, %v547_v6   ;;  %556 = vperm.xlu1 %3160, %v546_v7  }
  0x16   : > { %530 = vmatpush.msra.mxu1 %v3545_v8  ;;  %3142 = vmatpush.msra.mxu3 %v3545_v8 }
  0x17   : > { %551 = vperm.xlu2 %3161, %v545_v12  }
  0x18   : > { %531 = vmatpush.msra.mxu1 %v3549_v9  ;;  %3143 = vmatpush.msra.mxu3 %v3549_v9 }
  0x19   : > { %3012 = vmatmul.msk.f32.vlgmr.msra.gmra.mxu1 %vm503_vm0, %v499_v10  ;;  %3014 = vmatmul.msk.f32.vlgmr.msra.gmra.mxu3 %vm503_vm0, %v501_v11 }
  0x1d   : > { %584 = vperm.xlu0 %3159, %v574_v13   ;;  %579 = vperm.xlu1 %3160, %v573_v14  }
  0x1f   : > { %671 = vperm.xlu2 %3161, %v653_v17  }
  0x21   : > { %3013 = vmatmul.msk.f32.gmra.mxu1 %vm503_vm0, %v500_v15  ;;  %3015 = vmatmul.msk.f32.gmra.mxu3 %vm503_vm0, %v502_v16 }
  0x25   : > { %666 = vperm.xlu0 %3159, %v652_v18   ;;  %699 = vperm.xlu1 %3160, %v681_v19  }
  0x27   : > { %661 = vperm.xlu2 %3161, %v651_v20   ;;  %v725_v20 = vld [vmem:[%s4748_s7 + $0x58] sm:$0xff] }
  0x2d   : > { %694 = vperm.xlu0 %3159, %v680_v21   ;;  %656 = vperm.xlu1 %3160, %v650_v22   ;;  %v716_v21 = vld [vmem:[%s4748_s7 + $0x10] sm:$0xff]  ;;  %v726_v22 = vld [vmem:[%s4748_s7 + $0x60] sm:$0xff] }
  0x2f   : > { %689 = vperm.xlu2 %3161, %v679_v23   ;;  %v717_v23 = vld [vmem:[%s4748_s7 + $0x18] sm:$0xff] }
  0x35   : > { %684 = vperm.xlu0 %3159, %v678_v24   ;;  %v727_v24 = vld [vmem:[%s4748_s7 + $0x68] sm:$0xff] }
  0x69   : > { %v590_v28 = vpop.permute.xlu2 %589 }
  0x71   : > { %v552_v37 = vpop.permute.xlu2 %551 }
  0x79   : > { %v672_v54 = vpop.permute.xlu2 %671 }
  0x7f   : > { %v567_v25 = vpop.permute.xlu0 %566  ;;  %v595_v26 = vpop.permute.xlu1 %594 }
  0x81   : > { %v662_v58 = vpop.permute.xlu2 %661 }
  0x87   : > { %v562_v30 = vpop.permute.xlu0 %561  ;;  %v557_v31 = vpop.permute.xlu1 %556 }
  0x89   : > { %v690_v6 = vpop.permute.xlu2 %689 }
  0x8f   : > { %v585_v41 = vpop.permute.xlu0 %584  ;;  %v580_v44 = vpop.permute.xlu1 %579 }
  0x96   : > { %v533_v27 = vpop.f32.mrf.mxu1 }
  0x97   : > { %v569_v38 = vmul.f32 %v552_v37, %v533_v27  ;;  %v667_v55 = vpop.permute.xlu0 %666  ;;  %v700_v57 = vpop.permute.xlu1 %699  ;;  %v719_v27 = vld [vmem:[%s4748_s7 + $0x28] sm:$0xff] }
  0x98   : > { %v735_v37 = vld [vmem:[%s4748_s7 + $0xa8] sm:$0xff] }
  0x99   : > { %v597_v46 = vadd.f32 %v580_v44, %v569_v38 }
  0x9b   : > { %v601_v48 = vmax.f32 %v597_v46, 0.0 }
  0x9c   : > { %v539_v29 = vpop.f32.mrf.mxu3 }
  0x9d   : > { %v571_v33 = vmul.f32 %v562_v30, %v539_v29  ;;  %v720_v29 = vld [vmem:[%s4748_s7 + $0x30] sm:$0xff]  ;;  %v730_v30 = vld [vmem:[%s4748_s7 + $0x80] sm:$0xff] }
  0x9e   : > { %v536_v32 = vpop.f32.mrf.mxu1 }
  0x9f   : > { %v570_v35 = vmul.f32 %v557_v31, %v536_v32  ;;  %v599_v40 = vadd.f32 %v590_v28, %v571_v33  ;;  %v695_v60 = vpop.permute.xlu0 %694  ;;  %v657_v63 = vpop.permute.xlu1 %656  ;;  %v729_v28 = vld [vmem:[%s4748_s7 + $0x78] sm:$0xff]  ;;  %v731_v32 = vld [vmem:[%s4748_s7 + $0x88] sm:$0xff]  ;;  %v732_v33 = vld [vmem:[%s4748_s7 + $0x90] sm:$0xff] }
  0xa0   : > { %v721_v31 = vld [vmem:[%s4748_s7 + $0x38] sm:$0xff] }
  0xa1   : > { %v598_v43 = vadd.f32 %v585_v41, %v570_v35  ;;  %v603_v45 = vmax.f32 %v599_v40, 0.0  ;;  %v734_v35 = vld [vmem:[%s4748_s7 + $0xa0] sm:$0xff]  ;;  %v736_v40 = vld [vmem:[%s4748_s7 + $0xb0] sm:$0xff] }
  0xa3   : > { %v602_v47 = vmax.f32 %v598_v43, 0.0  ;;  %v737_v43 = vld [vmem:[%s4748_s7 + $0xb8] sm:$0xff] }
  0xa4   : > { %v542_v34 = vpop.f32.mrf.mxu3 }
  0xa5   : > { %v572_v36 = vmul.f32 %v567_v25, %v542_v34  ;;  %v718_v25 = vld [vmem:[%s4748_s7 + $0x20] sm:$0xff]  ;;  %v733_v34 = vld [vmem:[%s4748_s7 + $0x98] sm:$0xff] }
  0xa7   : > { %v600_v39 = vadd.f32 %v595_v26, %v572_v36  ;;  %v685_v11 = vpop.permute.xlu0 %684  ;;  %v728_v26 = vld [vmem:[%s4748_s7 + $0x70] sm:$0xff] }
  0xa9   : > { %v604_v42 = vmax.f32 %v600_v39, 0.0 }
  0xab   : > { %633 = vmatpush.msrb.mxu1 %v604_v42 }
  0xad   : > { %634 = vmatpush.msrb.mxu1 %v603_v45 }
  0xaf   : > { %635 = vmatpush.msrb.mxu1 %v602_v47 }
  0xb1   : > { %636 = vmatpush.msrb.mxu1 %v601_v48 }
  0xb2   : > { %3016 = vmatmul.msk.f32.vlgmr.msrb.gmra.mxu1 %vm503_vm0, %v605_v49 }
  0xba   : > { %3017 = vmatmul.msk.f32.gmra.mxu1 %vm503_vm0, %v606_v50 }
  0xc2   : > { %3018 = vmatmul.msk.f32.gmra.mxu1 %vm503_vm0, %v607_v51 }
  0xca   : > { %3019 = vmatmul.msk.f32.gmra.mxu1 %vm503_vm0, %v608_v52 }
 0x12f   : > { %v638_v53 = vpop.f32.mrf.mxu1 }
 0x130   : > { %v674_v1 = vmul.f32 %v657_v63, %v638_v53 }
 0x132   : > { %v702_v12 = vadd.f32 %v685_v11, %v674_v1 }
 0x134   : > { %v706_v18 = vadd.f32 %v702_v12, %v3549_v9  ;;  %v715_v9 = vld [vmem:[%s4748_s7 + $0x8] sm:$0xff] }
 0x137   : > { %v641_v56 = vpop.f32.mrf.mxu1 }
 0x138   : > { %v675_v62 = vmul.f32 %v662_v58, %v641_v56 }
 0x13a   : > { %v703_v7 = vadd.f32 %v690_v6, %v675_v62 }
 0x13c   : > { %v707_v16 = vadd.f32 %v703_v7, %v3545_v8  ;;  %v724_v8 = vld [vmem:[%s4748_s7 + $0x50] sm:$0xff] }
 0x13e   : > { %v3632_v19 = vmax.f32 %v707_v16, 0.0 }
 0x13f   : > { %v644_v59 = vpop.f32.mrf.mxu1 }
 0x140   : > { %v676_v61 = vmul.f32 %v667_v55, %v644_v59  ;;  %4759 = vst [vmem:[#allocation3_spill] sm:$0xff] %v3632_v19 }
 0x142   : > { %v704_v2 = vadd.f32 %v695_v60, %v676_v61 }
 0x144   : > { %v708_v14 = vadd.f32 %v704_v2, %v3535_v5  ;;  %v714_v5 = vld [vmem:[%s4748_s7] sm:$0xff] }
 0x146   : > { %v3627_v17 = vmax.f32 %v708_v14, 0.0 }
 0x147   : > { %v647_v0 = vpop.f32.mrf.mxu1 }
 0x148   : > { %v677_v3 = vmul.f32 %v672_v54, %v647_v0 }
 0x14a   : > { %v705_v10 = vadd.f32 %v700_v57, %v677_v3 }
 0x14c   : > { %v709_v13 = vadd.f32 %v705_v10, %v3533_v4  ;;  %v3636_v4 = vmax.f32 %v706_v18, 0.0 }
 0x14e   : > { %v3622_v15 = vmax.f32 %v709_v13, 0.0  ;;  %4760 = vst [vmem:[#allocation4_spill] sm:$0xff] %v3636_v4 }
 0x150   : > { %918 = vmatpush.msra.mxu0 %v3622_v15  ;;  %3144 = vmatpush.msra.mxu2 %v3622_v15 }
 0x152   : > { %919 = vmatpush.msra.mxu0 %v3627_v17  ;;  %3145 = vmatpush.msra.mxu2 %v3627_v17 }
 0x154   : > { %920 = vmatpush.msra.mxu0 %v3632_v19  ;;  %3146 = vmatpush.msra.mxu2 %v3632_v19 }
 0x156   : > { %921 = vmatpush.msra.mxu0 %v3636_v4  ;;  %3147 = vmatpush.msra.mxu2 %v3636_v4 }
 0x157   : > { %3020 = vmatmul.msk.f32.vlgmr.msra.gmra.mxu0 %vm503_vm0, %v714_v5  ;;  %3030 = vmatmul.msk.f32.vlgmr.msra.gmra.mxu2 %vm503_vm0, %v724_v8 }
 0x15f   : > { %3021 = vmatmul.msk.f32.gmra.mxu0 %vm503_vm0, %v715_v9  ;;  %3031 = vmatmul.msk.f32.gmra.mxu2 %vm503_vm0, %v725_v20 }
 0x167   : > { %3022 = vmatmul.msk.f32.gmra.mxu0 %vm503_vm0, %v716_v21  ;;  %3032 = vmatmul.msk.f32.gmra.mxu2 %vm503_vm0, %v726_v22 }
 0x16f   : > { %3023 = vmatmul.msk.f32.gmra.mxu0 %vm503_vm0, %v717_v23  ;;  %3033 = vmatmul.msk.f32.gmra.mxu2 %vm503_vm0, %v727_v24 }
 0x177   : > { %3024 = vmatmul.msk.f32.gmra.mxu0 %vm503_vm0, %v718_v25  ;;  %3034 = vmatmul.msk.f32.gmra.mxu2 %vm503_vm0, %v728_v26 }
 0x17f   : > { %3025 = vmatmul.msk.f32.gmra.mxu0 %vm503_vm0, %v719_v27  ;;  %3035 = vmatmul.msk.f32.gmra.mxu2 %vm503_vm0, %v729_v28 }
 0x187   : > { %3026 = vmatmul.msk.f32.gmra.mxu0 %vm503_vm0, %v720_v29  ;;  %3036 = vmatmul.msk.f32.gmra.mxu2 %vm503_vm0, %v730_v30 }
 0x18f   : > { %3027 = vmatmul.msk.f32.gmra.mxu0 %vm503_vm0, %v721_v31  ;;  %3037 = vmatmul.msk.f32.gmra.mxu2 %vm503_vm0, %v731_v32 }
 0x197   : > { %3038 = vmatmul.msk.f32.gmra.mxu2 %vm503_vm0, %v732_v33 }
 0x19f   : > { %3039 = vmatmul.msk.f32.gmra.mxu2 %vm503_vm0, %v733_v34 }
 0x1a7   : > { %3040 = vmatmul.msk.f32.gmra.mxu2 %vm503_vm0, %v734_v35 }
 0x1af   : > { %3041 = vmatmul.msk.f32.gmra.mxu2 %vm503_vm0, %v735_v37 }
 0x1b7   : > { %3042 = vmatmul.msk.f32.gmra.mxu2 %vm503_vm0, %v736_v40 }
 0x1bf   : > { %3043 = vmatmul.msk.f32.gmra.mxu2 %vm503_vm0, %v737_v43 }
 0x1d4   : > { %v923_v36 = vpop.f32.mrf.mxu0 }
 0x1d5   : > { %1282 = vxpose.xlu1.b32.start [1/4] (short) %v923_v36, 128 }
 0x1da   : > { %v3720_v38 = vpop.f32.mrf.mxu2 }
 0x1dc   : > { %v926_v39 = vpop.f32.mrf.mxu0 }
 0x1dd   : > { %1283 = vxpose.xlu1.b32.cont [2/4] (short) %v926_v39, 128  ;;  %v1084_v39 = vlaneseq }
 0x1e2   : > { %v3726_v41 = vpop.f32.mrf.mxu2 }
 0x1e4   : > { %v929_v42 = vpop.f32.mrf.mxu0 }
 0x1e5   : > { %1284 = vxpose.xlu1.b32.cont [3/4] (short) %v929_v42, 128  ;;  %v1085_v42 = vand.u32 127, %v1084_v39 }
 0x1e7   : > { %vm1216_vm1 = vcmp.ge.s32.totalorder %v1085_v42, 64  ;;  %vm1151_vm2 = vcmp.lt.s32.totalorder %v1085_v42, 64 }
 0x1ea   : > { %v3732_v44 = vpop.f32.mrf.mxu2 }
 0x1ec   : > { %v932_v45 = vpop.f32.mrf.mxu0 }
 0x1ed   : > { %1285 = vxpose.xlu1.b32.end [4/4] (short) %v932_v45, 128 }
 0x1f2   : > { %v3734_v46 = vpop.f32.mrf.mxu2 }
 0x1f4   : > { %v935_v47 = vpop.f32.mrf.mxu0 }
 0x1f5   : > { %1636 = vxpose.xlu2.b32.start [1/4] (short) %v935_v47, 128 }
 0x1fa   : > { %v3736_v48 = vpop.f32.mrf.mxu2 }
 0x1fc   : > { %v938_v49 = vpop.f32.mrf.mxu0 }
 0x1fd   : > { %1637 = vxpose.xlu2.b32.cont [2/4] (short) %v938_v49, 128 }
 0x202   : > { %v3738_v50 = vpop.f32.mrf.mxu2 }
 0x204   : > { %v941_v51 = vpop.f32.mrf.mxu0 }
 0x205   : > { %1638 = vxpose.xlu2.b32.cont [3/4] (short) %v941_v51, 128  ;;  %v3427_v51 = vmov -1e+30  }
 0x20a   : > { %v971_v52 = vpop.f32.mrf.mxu2 }
 0x20c   : > { %v944_v53 = vpop.f32.mrf.mxu0 }
 0x20d   : > { %1639 = vxpose.xlu2.b32.end [4/4] (short) %v944_v53, 128 }
 0x212   : > { %v974_v54 = vpop.f32.mrf.mxu2 }
 0x21a   : > { %v977_v55 = vpop.f32.mrf.mxu2 }
 0x222   : > { %v980_v56 = vpop.f32.mrf.mxu2 }
 0x223   : > { %1374 = vmatpush.msrb.mxu3 %v980_v56 }
 0x225   : > { %1375 = vmatpush.msrb.mxu3 %v977_v55 }
 0x227   : > { %1376 = vmatpush.msrb.mxu3 %v974_v54 }
 0x229   : > { %1377 = vmatpush.msrb.mxu3 %v971_v52  ;;  %v3786_v52 = vsel %vm1216_vm1, 0.0, %v3427_v51 }
 0x22a   : > { %v983_v58 = vpop.f32.mrf.mxu2 }
 0x232   : > { %v986_v60 = vpop.f32.mrf.mxu2 }
 0x23a   : > { %v989_v62 = vpop.f32.mrf.mxu2 }
 0x242   : > { %v992_v0 = vpop.f32.mrf.mxu2 }
 0x243   : > { %1728 = vmatpush.msra.mxu1 %v992_v0 }
 0x245   : > { %1729 = vmatpush.msra.mxu1 %v989_v62 }
 0x247   : > { %1730 = vmatpush.msra.mxu1 %v986_v60 }
 0x249   : > { %1731 = vmatpush.msra.mxu1 %v983_v58 }
 0x279   : > { %v1298_v57 = vpop.trf.xlu1 }
 0x27a   : > { %3068 = vmatmul.msk.f32.vlgmr.msrb.gmra.mxu3 %vm503_vm0, %v1298_v57 }
 0x281   : > { %v1299_v59 = vpop.trf.xlu1 }
 0x282   : > { %3069 = vmatmul.msk.f32.gmra.mxu3 %vm503_vm0, %v1299_v59 }
 0x289   : > { %v1300_v61 = vpop.trf.xlu1 }
 0x28a   : > { %3070 = vmatmul.msk.f32.gmra.mxu3 %vm503_vm0, %v1300_v61 }
 0x28e   : > { %v1652_v2 = vpop.trf.xlu2 }
 0x28f   : > { %3084 = vmatmul.msk.f32.vlgmr.msra.gmra.mxu1 %vm503_vm0, %v1652_v2 }
 0x291   : > { %v1301_v63 = vpop.trf.xlu1 }
 0x292   : > { %3071 = vmatmul.msk.f32.gmra.mxu3 %vm503_vm0, %v1301_v63 }
 0x296   : > { %v1653_v6 = vpop.trf.xlu2 }
 0x297   : > { %3085 = vmatmul.msk.f32.gmra.mxu1 %vm503_vm0, %v1653_v6 }
 0x299   : > { %v1302_v1 = vpop.trf.xlu1 }
 0x29a   : > { %3072 = vmatmul.msk.f32.gmra.mxu3 %vm503_vm0, %v1302_v1 }
 0x29e   : > { %v1654_v10 = vpop.trf.xlu2 }
 0x29f   : > { %3086 = vmatmul.msk.f32.gmra.mxu1 %vm503_vm0, %v1654_v10 }
 0x2a1   : > { %v1303_v3 = vpop.trf.xlu1 }
 0x2a2   : > { %3073 = vmatmul.msk.f32.gmra.mxu3 %vm503_vm0, %v1303_v3 }
 0x2a6   : > { %v1655_v12 = vpop.trf.xlu2 }
 0x2a7   : > { %3087 = vmatmul.msk.f32.gmra.mxu1 %vm503_vm0, %v1655_v12 }
 0x2a9   : > { %v1304_v7 = vpop.trf.xlu1 }
 0x2aa   : > { %3074 = vmatmul.msk.f32.gmra.mxu3 %vm503_vm0, %v1304_v7 }
 0x2ae   : > { %v1656_v14 = vpop.trf.xlu2 }
 0x2af   : > { %3088 = vmatmul.msk.f32.gmra.mxu1 %vm503_vm0, %v1656_v14 }
 0x2b1   : > { %v1305_v11 = vpop.trf.xlu1 }
 0x2b2   : > { %3075 = vmatmul.msk.f32.gmra.mxu3 %vm503_vm0, %v1305_v11  ;;  %v3811_v11 = vsel %vm1151_vm2, 0.0, %v3427_v51 }
 0x2b6   : > { %v1657_v18 = vpop.trf.xlu2 }
 0x2b7   : > { %3089 = vmatmul.msk.f32.gmra.mxu1 %vm503_vm0, %v1657_v18 }
 0x2b9   : > { %v1306_v13 = vpop.trf.xlu1 }
 0x2ba   : > { %3076 = vmatmul.msk.f32.gmra.mxu3 %vm503_vm0, %v1306_v13 }
 0x2be   : > { %v1658_v21 = vpop.trf.xlu2 }
 0x2bf   : > { %3090 = vmatmul.msk.f32.gmra.mxu1 %vm503_vm0, %v1658_v21 }
 0x2c1   : > { %v1307_v16 = vpop.trf.xlu1 }
 0x2c2   : > { %3077 = vmatmul.msk.f32.gmra.mxu3 %vm503_vm0, %v1307_v16 }
 0x2c6   : > { %v1659_v23 = vpop.trf.xlu2 }
 0x2c7   : > { %3091 = vmatmul.msk.f32.gmra.mxu1 %vm503_vm0, %v1659_v23 }
 0x2c9   : > { %v1308_v5 = vpop.trf.xlu1 }
 0x2ca   : > { %3078 = vmatmul.msk.f32.gmra.mxu3 %vm503_vm0, %v1308_v5 }
 0x2ce   : > { %v1660_v25 = vpop.trf.xlu2 }
 0x2cf   : > { %3092 = vmatmul.msk.f32.gmra.mxu1 %vm503_vm0, %v1660_v25 }
 0x2d1   : > { %v1309_v8 = vpop.trf.xlu1 }
 0x2d2   : > { %3079 = vmatmul.msk.f32.gmra.mxu3 %vm503_vm0, %v1309_v8 }
 0x2d6   : > { %v1661_v29 = vpop.trf.xlu2 }
 0x2d7   : > { %3093 = vmatmul.msk.f32.gmra.mxu1 %vm503_vm0, %v1661_v29 }
 0x2d9   : > { %v1310_v9 = vpop.trf.xlu1 }
 0x2da   : > { %3080 = vmatmul.msk.f32.gmra.mxu3 %vm503_vm0, %v1310_v9 }
 0x2de   : > { %v1662_v34 = vpop.trf.xlu2 }
 0x2df   : > { %3094 = vmatmul.msk.f32.gmra.mxu1 %vm503_vm0, %v1662_v34 }
 0x2e1   : > { %v1311_v30 = vpop.trf.xlu1 }
 0x2e2   : > { %3081 = vmatmul.msk.f32.gmra.mxu3 %vm503_vm0, %v1311_v30 }
 0x2e6   : > { %v1663_v43 = vpop.trf.xlu2 }
 0x2e7   : > { %3095 = vmatmul.msk.f32.gmra.mxu1 %vm503_vm0, %v1663_v43 }
 0x2e9   : > { %v1312_v35 = vpop.trf.xlu1 }
 0x2ea   : > { %3082 = vmatmul.msk.f32.gmra.mxu3 %vm503_vm0, %v1312_v35 }
 0x2ee   : > { %v1664_v56 = vpop.trf.xlu2 }
 0x2ef   : > { %3096 = vmatmul.msk.f32.gmra.mxu1 %vm503_vm0, %v1664_v56 }
 0x2f1   : > { %v1313_v45 = vpop.trf.xlu1 }
 0x2f2   : > { %3083 = vmatmul.msk.f32.gmra.mxu3 %vm503_vm0, %v1313_v45 }
 0x2f6   : > { %v1665_v61 = vpop.trf.xlu2 }
 0x2f7   : > { %3097 = vmatmul.msk.f32.gmra.mxu1 %vm503_vm0, %v1665_v61 }
 0x2fd   : > { %v3759_v20 = vpop.f32.mrf.mxu3 }
 0x2fe   : > { %v1666_v7 = vpop.trf.xlu2 }
 0x2ff   : > { %3098 = vmatmul.msk.f32.gmra.mxu1 %vm503_vm0, %v1666_v7 }
 0x305   : > { %v3762_v22 = vpop.f32.mrf.mxu3 }
 0x306   : > { %v1667_v14 = vpop.trf.xlu2 }
 0x307   : > { %3099 = vmatmul.msk.f32.gmra.mxu1 %vm503_vm0, %v1667_v14 }
 0x30c   : > { %v3776_v32 = vpop.f32.mrf.mxu1 }
 0x30d   : > { %v3765_v24 = vpop.f32.mrf.mxu3 }
 0x314   : > { %v3778_v36 = vpop.f32.mrf.mxu1 }
 0x315   : > { %v3768_v26 = vpop.f32.mrf.mxu3 }
 0x316   : > { %v1430_v29 = vmul.f32 0.17677669, %v3768_v26  ;;  %v1427_v26 = vmul.f32 0.17677669, %v3759_v20 }
 0x318   : > { %v3842_v30 = vadd.f32 %v1430_v29, %v3811_v11  ;;  %v3857_v39 = vadd.f32 %v1427_v26, %v3811_v11 }
 0x31c   : > { %v3782_v40 = vpop.f32.mrf.mxu1 }
 0x31d   : > { %v3770_v27 = vpop.f32.mrf.mxu3 }
 0x31e   : > { %v1431_v23 = vmul.f32 0.17677669, %v3770_v27  ;;  %v1428_v27 = vmul.f32 0.17677669, %v3762_v22 }
 0x320   : > { %v3837_v25 = vadd.f32 %v1431_v23, %v3811_v11  ;;  %v3852_v35 = vadd.f32 %v1428_v27, %v3811_v11 }
 0x324   : > { %v3792_v54 = vpop.f32.mrf.mxu1 }
 0x325   : > { %v3772_v28 = vpop.f32.mrf.mxu3 }
 0x326   : > { %v1432_v9 = vmul.f32 0.17677669, %v3772_v28 }
 0x328   : > { %v3832_v21 = vadd.f32 %v1432_v9, %v3811_v11 }
 0x32c   : > { %v3795_v58 = vpop.f32.mrf.mxu1 }
 0x32d   : > { %v1397_v31 = vpop.f32.mrf.mxu3 }
 0x32e   : > { %v1433_v5 = vmul.f32 0.17677669, %v1397_v31  ;;  %v1429_v31 = vmul.f32 0.17677669, %v3765_v24 }
 0x330   : > { %v3827_v8 = vadd.f32 %v1433_v5, %v3811_v11 }
 0x334   : > { %v1748_v1 = vpop.f32.mrf.mxu1 }
 0x335   : > { %v1400_v33 = vpop.f32.mrf.mxu3  ;;  %v1786_v6 = vmul.f32 0.17677669, %v1748_v1 }
 0x336   : > { %v1434_v16 = vmul.f32 0.17677669, %v1400_v33  ;;  %v3847_v33 = vadd.f32 %v1429_v31, %v3811_v11 }
 0x337   : > { %v3814_v12 = vadd.f32 %v1786_v6, %v3811_v11 }
 0x338   : > { %v3823_v18 = vadd.f32 %v1434_v16, %v3811_v11 }
 0x33c   : > { %v1751_v28 = vpop.f32.mrf.mxu1 }
 0x33d   : > { %v1403_v37 = vpop.f32.mrf.mxu3  ;;  %v1787_v45 = vmul.f32 0.17677669, %v1751_v28  ;;  %v1785_v28 = vmul.f32 0.17677669, %v3795_v58 }
 0x33e   : > { %v1435_v10 = vmul.f32 0.17677669, %v1403_v37 }
 0x340   : > { %v3817_v13 = vadd.f32 %v1435_v10, %v3786_v52 }
 0x344   : > { %v1754_v34 = vpop.f32.mrf.mxu1 }
 0x345   : > { %v1406_v47 = vpop.f32.mrf.mxu3  ;;  %v1788_v22 = vmul.f32 0.17677669, %v1754_v34  ;;  %v3901_v34 = vadd.f32 %v1785_v28, %v3811_v11 }
 0x346   : > { %v1436_v49 = vmul.f32 0.17677669, %v1406_v47  ;;  %v3869_v47 = vadd.f32 %v1787_v45, %v3811_v11 }
 0x347   : > { %v3865_v43 = vadd.f32 %v1788_v22, %v3811_v11 }
 0x348   : > { %v3789_v53 = vadd.f32 %v1436_v49, %v3786_v52 }
 0x34a   : > { %1477 = vmax.xlane.f32.xlu1 %v3789_v53 }
 0x34c   : > { %v1757_v37 = vpop.f32.mrf.mxu1 }
 0x34d   : > { %v1409_v55 = vpop.f32.mrf.mxu3  ;;  %v1789_v24 = vmul.f32 0.17677669, %v1757_v37 }
 0x34e   : > { %v1437_v62 = vmul.f32 0.17677669, %v1409_v55 }
 0x34f   : > { %v3861_v42 = vadd.f32 %v1789_v24, %v3786_v52 }
 0x350   : > { %v3803_v2 = vadd.f32 %v1437_v62, %v3786_v52 }
 0x354   : > { %v1760_v20 = vpop.f32.mrf.mxu1 }
 0x355   : > { %v1412_v57 = vpop.f32.mrf.mxu3  ;;  %v1790_v49 = vmul.f32 0.17677669, %v1760_v20 }
 0x356   : > { %v1438_v59 = vmul.f32 0.17677669, %v1412_v57 }
 0x357   : > { %v3873_v51 = vadd.f32 %v1790_v49, %v3786_v52 }
 0x358   : > { %v3798_v60 = vadd.f32 %v1438_v59, %v3786_v52 }
 0x35a   : > { %1481 = vmax.xlane.f32.xlu0 %v3798_v60 }
 0x35c   : > { %v1763_v61 = vpop.f32.mrf.mxu1 }
 0x35d   : > { %v1415_v63 = vpop.f32.mrf.mxu3  ;;  %v1791_v62 = vmul.f32 0.17677669, %v1763_v61 }
 0x35e   : > { %v1439_v0 = vmul.f32 0.17677669, %v1415_v63 }
 0x35f   : > { %v3884_v1 = vadd.f32 %v1791_v62, %v3786_v52 }
 0x360   : > { %v3806_v3 = vadd.f32 %v1439_v0, %v3786_v52 }
 0x362   : > { %1479 = vmax.xlane.f32.xlu0 %v3803_v2  ;;  %1483 = vmax.xlane.f32.xlu2 %v3806_v3 }
 0x364   : > { %v1766_v9 = vpop.f32.mrf.mxu1 }
 0x365   : > { %v1418_v55 = vpop.f32.mrf.mxu3 }
 0x366   : > { %v1440_v56 = vmul.f32 0.17677669, %v1418_v55 }
 0x368   : > { %v3879_v59 = vadd.f32 %v1440_v56, %v3786_v52 }
 0x36a   : > { %1475 = vmax.xlane.f32.xlu0 %v3817_v13  ;;  %1823 = vmax.xlane.f32.xlu2 %v3814_v12 }
 0x36c   : > { %v1769_v22 = vpop.f32.mrf.mxu1 }
 0x36d   : > { %v1421_v6 = vpop.f32.mrf.mxu3  ;;  %v1793_v56 = vmul.f32 0.17677669, %v1769_v22 }
 0x36e   : > { %v1441_v10 = vmul.f32 0.17677669, %v1421_v6 }
 0x370   : > { %v3889_v5 = vadd.f32 %v1441_v10, %v3786_v52 }
 0x372   : > { %1473 = vmax.xlane.f32.xlu0 %v3823_v18 }
 0x374   : > { %v1772_v61 = vpop.f32.mrf.mxu1 }
 0x375   : > { %v1424_v26 = vpop.f32.mrf.mxu3 }
 0x376   : > { %v1442_v58 = vmul.f32 0.17677669, %v1424_v26 }
 0x378   : > { %v3910_v20 = vadd.f32 %v1442_v58, %v3786_v52 }
 0x37a   : > { %1471 = vmax.xlane.f32.xlu0 %v3827_v8 }
 0x382   : > { %1469 = vmax.xlane.f32.xlu0 %v3832_v21 }
 0x38a   : > { %1467 = vmax.xlane.f32.xlu0 %v3837_v25 }
 0x392   : > { %1465 = vmax.xlane.f32.xlu0 %v3842_v30 }
 0x39a   : > { %1463 = vmax.xlane.f32.xlu0 %v3847_v33 }
 0x3a2   : > { %1461 = vmax.xlane.f32.xlu0 %v3852_v35 }
 0x3aa   : > { %1459 = vmax.xlane.f32.xlu0 %v3857_v39 }
 0x3b2   : > { %1829 = vmax.xlane.f32.xlu0 %v3861_v42 }
 0x3ba   : > { %1827 = vmax.xlane.f32.xlu0 %v3865_v43 }
 0x3c2   : > { %1825 = vmax.xlane.f32.xlu0 %v3869_v47 }
 0x3ca   : > { %1831 = vmax.xlane.f32.xlu0 %v3873_v51 }
 0x3cd   : > { %v3876_v57 = vpop.xlane.xlu0 %1481 }
 0x3d2   : > { %1485 = vmax.xlane.f32.xlu0 %v3879_v59 }
 0x3d5   : > { %v1480_v63 = vpop.xlane.xlu0 %1479 }
 0x3d6   : > { %v1501_v0 = vsub.f32 %v3803_v2, %v1480_v63  ;;  %v1792_v2 = vmul.f32 0.17677669, %v1766_v9 }
 0x3d8   : > { %v1527_v7 = vmul.f32 1.442695, %v1501_v0  ;;  %v3918_v0 = vadd.f32 %v1793_v56, %v3786_v52 }
 0x3da   : > { %3162 = vpow2.f32 %v1527_v7  ;;  %1833 = vmax.xlane.f32.xlu0 %v3884_v1  ;;  %v1794_v7 = vmul.f32 0.17677669, %v1772_v61 }
 0x3dc   : > { %v3926_v9 = vadd.f32 %v1794_v7, %v3786_v52 }
 0x3dd   : > { %v1476_v14 = vpop.xlane.xlu0 %1475 }
 0x3de   : > { %v1499_v16 = vsub.f32 %v3817_v13, %v1476_v14  ;;  %v3898_v13 = vadd.f32 %v1792_v2, %v3786_v52  ;;  %v1775_v14 = vpop.f32.mrf.mxu1 }
 0x3df   : > { %v1795_v2 = vmul.f32 0.17677669, %v1775_v14 }
 0x3e0   : > { %v3891_v23 = vpop.eup %3162  ;;  %v1523_v29 = vmul.f32 1.442695, %v1499_v16 }
 0x3e1   : > { %1559 = vadd.xlane.f32.xlu1 %v3891_v23 }
 0x3e2   : > { %3164 = vpow2.f32 %v1523_v29  ;;  %1487 = vmax.xlane.f32.xlu0 %v3889_v5 }
 0x3e5   : > { %v1474_v31 = vpop.xlane.xlu0 %1473 }
 0x3e6   : > { %v1498_v27 = vsub.f32 %v3823_v18, %v1474_v31  ;;  %v3935_v31 = vadd.f32 %v1795_v2, %v3786_v52 }
 0x3e8   : > { %v3903_v37 = vpop.eup %3164  ;;  %v1521_v24 = vmul.f32 1.442695, %v1498_v27  ;;  %v1778_v27 = vpop.f32.mrf.mxu1 }
 0x3e9   : > { %1821 = vmax.xlane.f32.xlu1 %v3901_v34  ;;  %1555 = vadd.xlane.f32.xlu2 %v3903_v37 }
 0x3ea   : > { %3166 = vpow2.f32 %v1521_v24  ;;  %1835 = vmax.xlane.f32.xlu0 %v3898_v13  ;;  %v1502_v24 = vsub.f32 %v3798_v60, %v3876_v57 }
 0x3ed   : > { %v1472_v18 = vpop.xlane.xlu0 %1471 }
 0x3ee   : > { %v1497_v45 = vsub.f32 %v3827_v8, %v1472_v18  ;;  %v1529_v18 = vmul.f32 1.442695, %v1502_v24 }
 0x3f0   : > { %v3912_v49 = vpop.eup %3166  ;;  %v1519_v55 = vmul.f32 1.442695, %v1497_v45  ;;  %v1484_v45 = vpop.xlane.xlu2 %1483 }
 0x3f1   : > { %1553 = vadd.xlane.f32.xlu1 %v3912_v49 }
 0x3f2   : > { %3168 = vpow2.f32 %v1519_v55  ;;  %1489 = vmax.xlane.f32.xlu0 %v3910_v20  ;;  %v1503_v55 = vsub.f32 %v3806_v3, %v1484_v45 }
 0x3f4   : > { %v1531_v61 = vmul.f32 1.442695, %v1503_v55 }
 0x3f5   : > { %v1470_v62 = vpop.xlane.xlu0 %1469 }
 0x3f6   : > { %v1496_v63 = vsub.f32 %v3832_v21, %v1470_v62 }
 0x3f8   : > { %v3920_v8 = vpop.eup %3168  ;;  %v1517_v6 = vmul.f32 1.442695, %v1496_v63 }
 0x3f9   : > { %1551 = vadd.xlane.f32.xlu1 %v3920_v8 }
 0x3fa   : > { %3170 = vpow2.f32 %v1517_v6  ;;  %1837 = vmax.xlane.f32.xlu0 %v3918_v0 }
 0x3fd   : > { %v1468_v10 = vpop.xlane.xlu0 %1467 }
 0x3fe   : > { %v1495_v16 = vsub.f32 %v3837_v25, %v1468_v10  ;;  %v1796_v25 = vmul.f32 0.17677669, %v1778_v27 }
 0x400   : > { %v3928_v21 = vpop.eup %3170  ;;  %v1515_v29 = vmul.f32 1.442695, %v1495_v16  ;;  %v3946_v58 = vadd.f32 %v1796_v25, %v3786_v52 }
 0x401   : > { %1549 = vadd.xlane.f32.xlu1 %v3928_v21 }
 0x402   : > { %3172 = vpow2.f32 %v1515_v29  ;;  %1839 = vmax.xlane.f32.xlu0 %v3926_v9 }
 0x403   : > { %3174 = vpow2.f32 %v1529_v18 }
 0x404   : > { %3176 = vpow2.f32 %v1531_v61 }
 0x405   : > { %v3932_v28 = vpop.xlane.xlu0 %1465 }
 0x408   : > { %v3937_v26 = vpop.eup %3172 }
 0x409   : > { %1547 = vadd.xlane.f32.xlu1 %v3937_v26  ;;  %v3950_v62 = vpop.eup %3174 }
 0x40a   : > { %1841 = vmax.xlane.f32.xlu0 %v3935_v31  ;;  %v3955_v57 = vpop.eup %3176 }
 0x40d   : > { %v3943_v22 = vpop.xlane.xlu0 %1463 }
 0x412   : > { %1843 = vmax.xlane.f32.xlu0 %v3946_v58 }
 0x415   : > { %v1462_v56 = vpop.xlane.xlu0 %1461 }
 0x41a   : > { %1561 = vadd.xlane.f32.xlu0 %v3950_v62 }
 0x41d   : > { %v3953_v60 = vpop.xlane.xlu0 %1459 }
 0x422   : > { %1563 = vadd.xlane.f32.xlu0 %v3955_v57 }
 0x425   : > { %v1830_v63 = vpop.xlane.xlu0 %1829 }
 0x42d   : > { %v3958_v6 = vpop.xlane.xlu0 %1827 }
 0x435   : > { %v3960_v7 = vpop.xlane.xlu0 %1825 }
 0x43d   : > { %v3962_v10 = vpop.xlane.xlu0 %1831 }
 0x445   : > { %v1486_v3 = vpop.xlane.xlu0 %1485 }
 0x446   : > { %v1504_v14 = vsub.f32 %v3879_v59, %v1486_v3  ;;  %v1492_v59 = vsub.f32 %v3852_v35, %v1462_v56 }
 0x448   : > { %v1533_v16 = vmul.f32 1.442695, %v1504_v14  ;;  %v1509_v3 = vmul.f32 1.442695, %v1492_v59 }
 0x44a   : > { %3178 = vpow2.f32 %v1533_v16  ;;  %v1478_v16 = vpop.xlane.xlu1 %1477 }
 0x44d   : > { %v3965_v29 = vpop.xlane.xlu0 %1833 }
 0x450   : > { %v3967_v2 = vpop.eup %3178 }
 0x451   : > { %1565 = vadd.xlane.f32.xlu0 %v3967_v2 }
 0x455   : > { %v1488_v27 = vpop.xlane.xlu0 %1487 }
 0x456   : > { %v1505_v25 = vsub.f32 %v3889_v5, %v1488_v27  ;;  %v1500_v27 = vsub.f32 %v3789_v53, %v1478_v16 }
 0x458   : > { %v1535_v24 = vmul.f32 1.442695, %v1505_v25  ;;  %v1525_v35 = vmul.f32 1.442695, %v1500_v27 }
 0x45a   : > { %3180 = vpow2.f32 %v1535_v24 }
 0x45d   : > { %v1836_v18 = vpop.xlane.xlu0 %1835 }
 0x45e   : > { %v1856_v45 = vsub.f32 %v3898_v13, %v1836_v18  ;;  %v1853_v13 = vsub.f32 %v3861_v42, %v1830_v63 }
 0x460   : > { %v3972_v55 = vpop.eup %3180  ;;  %v1883_v61 = vmul.f32 1.442695, %v1856_v45  ;;  %v1877_v25 = vmul.f32 1.442695, %v1853_v13  ;;  %v1824_v45 = vpop.xlane.xlu2 %1823 }
 0x461   : > { %1567 = vadd.xlane.f32.xlu0 %v3972_v55 }
 0x462   : > { %3182 = vpow2.f32 %v1883_v61 }
 0x463   : > { %3184 = vpow2.f32 %v1509_v3  ;;  %v1784_v3 = vmul.f32 0.17677669, %v3792_v54  ;;  %v1783_v54 = vmul.f32 0.17677669, %v3782_v40 }
 0x465   : > { %v1490_v14 = vpop.xlane.xlu0 %1489  ;;  %v3999_v16 = vadd.f32 %v1784_v3, %v3811_v11 }
 0x466   : > { %v1506_v4 = vsub.f32 %v3910_v20, %v1490_v14 }
 0x468   : > { %v3977_v19 = vpop.eup %3182  ;;  %v1537_v5 = vmul.f32 1.442695, %v1506_v4  ;;  %v1850_v4 = vsub.f32 %v3814_v12, %v1824_v45 }
 0x469   : > { %1915 = vadd.xlane.f32.xlu1 %v3977_v19  ;;  %v3982_v24 = vpop.eup %3184 }
 0x46a   : > { %3186 = vpow2.f32 %v1537_v5  ;;  %v1871_v63 = vmul.f32 1.442695, %v1850_v4 }
 0x46b   : > { %3188 = vpow2.f32 %v1525_v35  ;;  %v4011_v35 = vadd.f32 %v1783_v54, %v3811_v11  ;;  %v723_v54 = vld [vmem:[%s4748_s7 + $0x48] sm:$0xff] }
 0x46c   : > { %3190 = vpow2.f32 %v1877_v25 }
 0x46d   : > { %v1838_v56 = vpop.xlane.xlu0 %1837 }
 0x46e   : > { %v1857_v4 = vsub.f32 %v3918_v0, %v1838_v56  ;;  %v1781_v0 = vmul.f32 0.17677669, %v3776_v32  ;;  %v1855_v32 = vsub.f32 %v3884_v1, %v3965_v29  ;;  %v1852_v1 = vsub.f32 %v3865_v43, %v3958_v6 }
 0x46f   : > { %v1851_v43 = vsub.f32 %v3869_v47, %v3960_v7  ;;  %v739_v47 = vld [vmem:[%s4748_s7 + $0xc8] sm:$0xff] }
 0x470   : > { %v3984_v18 = vpop.eup %3186  ;;  %v4032_v3 = vadd.f32 %v1781_v0, %v3811_v11 }
 0x471   : > { %1541 = vadd.xlane.f32.xlu1 %v3982_v24  ;;  %1569 = vadd.xlane.f32.xlu0 %v3984_v18  ;;  %v3990_v20 = vpop.eup %3188 }
 0x472   : > { %v3992_v61 = vpop.eup %3190 }
 0x475   : > { %v1840_v53 = vpop.xlane.xlu0 %1839 }
 0x476   : > { %v1858_v42 = vsub.f32 %v3926_v9, %v1840_v53  ;;  %v1782_v53 = vmul.f32 0.17677669, %v3778_v36 }
 0x478   : > { %v1887_v59 = vmul.f32 1.442695, %v1858_v42  ;;  %v1885_v42 = vmul.f32 1.442695, %v1857_v4  ;;  %v4020_v40 = vadd.f32 %v1782_v53, %v3811_v11  ;;  %v1873_v4 = vmul.f32 1.442695, %v1851_v43 }
 0x479   : > { %1909 = vadd.xlane.f32.xlu1 %v3992_v61  ;;  %1557 = vadd.xlane.f32.xlu0 %v3990_v20 }
 0x47a   : > { %3192 = vpow2.f32 %v1887_v59  ;;  %v1493_v59 = vsub.f32 %v3847_v33, %v3943_v22  ;;  %v722_v33 = vld [vmem:[%s4748_s7 + $0x40] sm:$0xff]  ;;  %v4046_v22 = vpop.xlane.xlu1 %1559 }
 0x47b   : > { %3194 = vpow2.f32 %v1871_v63  ;;  %v1494_v63 = vsub.f32 %v3842_v30, %v3932_v28  ;;  %v1854_v30 = vsub.f32 %v3873_v51, %v3962_v10  ;;  %3028 = vmatmul.msk.f32.gmra.mxu0 %vm503_vm0, %v722_v33  ;;  %v1491_v10 = vsub.f32 %v3857_v39, %v3953_v60 }
 0x47c   : > { %v1511_v56 = vmul.f32 1.442695, %v1493_v59  ;;  %v740_v59 = vld [vmem:[%s4748_s7 + $0xd0] sm:$0xff] }
 0x47d   : > { %v1842_v14 = vpop.xlane.xlu0 %1841  ;;  %v1513_v36 = vmul.f32 1.442695, %v1494_v63  ;;  %v1879_v28 = vmul.f32 1.442695, %v1854_v30  ;;  %v1507_v29 = vmul.f32 1.442695, %v1491_v10 }
 0x47e   : > { %v1859_v12 = vsub.f32 %v3935_v31, %v1842_v14  ;;  %v742_v30 = vld [vmem:[%s4748_s7 + $0xe0] sm:$0xff] }
 0x480   : > { %v4001_v9 = vpop.eup %3192  ;;  %v1889_v5 = vmul.f32 1.442695, %v1859_v12  ;;  %v1881_v12 = vmul.f32 1.442695, %v1855_v32  ;;  %v743_v32 = vld [vmem:[%s4748_s7 + $0xe8] sm:$0xff] }
 0x481   : > { %v4003_v27 = vpop.eup %3194  ;;  %1919 = vadd.xlane.f32.xlu2 %v4001_v9  ;;  %1819 = vmax.xlane.f32.xlu0 %v3999_v16 }
 0x482   : > { %3196 = vpow2.f32 %v1889_v5  ;;  %1903 = vadd.xlane.f32.xlu1 %v4003_v27  ;;  %v1822_v60 = vpop.xlane.xlu1 %1821 }
 0x483   : > { %3029 = vmatmul.msk.f32.gmra.mxu0 %vm503_vm0, %v723_v54  ;;  %v1849_v6 = vsub.f32 %v3901_v34, %v1822_v60 }
 0x485   : > { %v1844_v13 = vpop.xlane.xlu0 %1843  ;;  %v1869_v53 = vmul.f32 1.442695, %v1849_v6  ;;  %v746_v6 = vld [vmem:[%s4748_s7 + $0x100] sm:$0xff] }
 0x486   : > { %v1860_v31 = vsub.f32 %v3946_v58, %v1844_v13  ;;  %v738_v13 = vld [vmem:[%s4748_s7 + $0xc0] sm:$0xff] }
 0x487   : > { %3044 = vmatmul.msk.f32.gmra.mxu2 %vm503_vm0, %v738_v13  ;;  %v1556_v13 = vpop.xlane.xlu2 %1555 }
 0x488   : > { %v4013_v25 = vpop.eup %3196  ;;  %v1891_v45 = vmul.f32 1.442695, %v1860_v31  ;;  %v1875_v31 = vmul.f32 1.442695, %v1852_v1  ;;  %v745_v1 = vld [vmem:[%s4748_s7 + $0xf8] sm:$0xff] }
 0x489   : > { %1921 = vadd.xlane.f32.xlu2 %v4013_v25  ;;  %1817 = vmax.xlane.f32.xlu0 %v4011_v35 }
 0x48a   : > { %3198 = vpow2.f32 %v1891_v45 }
 0x48b   : > { %3200 = vpow2.f32 %v1885_v42 }
 0x48c   : > { %3202 = vpow2.f32 %v1513_v36  ;;  %v741_v36 = vld [vmem:[%s4748_s7 + $0xd8] sm:$0xff] }
 0x48d   : > { %3204 = vpow2.f32 %v1511_v56  ;;  %v1562_v0 = vpop.xlane.xlu0 %1561 }
 0x48e   : > { %3206 = vpow2.f32 %v1879_v28 }
 0x48f   : > { %3208 = vpow2.f32 %v1881_v12  ;;  %3045 = vmatmul.msk.f32.gmra.mxu2 %vm503_vm0, %v739_v47  ;;  %v744_v12 = vld [vmem:[%s4748_s7 + $0xf0] sm:$0xff] }
 0x490   : > { %v4022_v58 = vpop.eup %3198  ;;  %3210 = vpow2.f32 %v1507_v29  ;;  %v1554_v29 = vpop.xlane.xlu1 %1553 }
 0x491   : > { %1923 = vadd.xlane.f32.xlu2 %v4022_v58  ;;  %1815 = vmax.xlane.f32.xlu0 %v4020_v40  ;;  %v4034_v14 = vpop.eup %3200  ;;  %3212 = vpow2.f32 %v1875_v31 }
 0x492   : > { %v4048_v5 = vpop.eup %3202  ;;  %3214 = vpow2.f32 %v1873_v4 }
 0x493   : > { %v4050_v51 = vpop.eup %3204  ;;  %3216 = vpow2.f32 %v1869_v53 }
 0x494   : > { %v4066_v39 = vpop.eup %3206 }
 0x495   : > { %v4068_v45 = vpop.eup %3208  ;;  %v1564_v56 = vpop.xlane.xlu0 %1563 }
 0x496   : > { %v4075_v42 = vpop.eup %3210 }
 0x497   : > { %v4077_v63 = vpop.eup %3212  ;;  %3046 = vmatmul.msk.f32.gmra.mxu2 %vm503_vm0, %v740_v59 }
 0x498   : > { %v4085_v7 = vpop.eup %3214  ;;  %v1552_v47 = vpop.xlane.xlu1 %1551 }
 0x499   : > { %1917 = vadd.xlane.f32.xlu2 %v4034_v14  ;;  %1813 = vmax.xlane.f32.xlu0 %v4032_v3  ;;  %v4087_v34 = vpop.eup %3216 }
 0x49f   : > { %3047 = vmatmul.msk.f32.gmra.mxu2 %vm503_vm0, %v741_v36 }
 0x4a1   : > { %1543 = vadd.xlane.f32.xlu2 %v4050_v51  ;;  %1545 = vadd.xlane.f32.xlu0 %v4048_v5 }
 0x4a7   : > { %3048 = vmatmul.msk.f32.gmra.mxu2 %vm503_vm0, %v742_v30 }
 0x4a9   : > { %1911 = vadd.xlane.f32.xlu2 %v4066_v39  ;;  %1913 = vadd.xlane.f32.xlu0 %v4068_v45 }
 0x4af   : > { %3049 = vmatmul.msk.f32.gmra.mxu2 %vm503_vm0, %v743_v32 }
 0x4b1   : > { %1907 = vadd.xlane.f32.xlu2 %v4077_v63  ;;  %1539 = vadd.xlane.f32.xlu0 %v4075_v42 }
 0x4b7   : > { %3050 = vmatmul.msk.f32.gmra.mxu2 %vm503_vm0, %v744_v12 }
 0x4b9   : > { %1901 = vadd.xlane.f32.xlu2 %v4087_v34  ;;  %1905 = vadd.xlane.f32.xlu0 %v4085_v7 }
 0x4bf   : > { %3051 = vmatmul.msk.f32.gmra.mxu2 %vm503_vm0, %v745_v1 }
 0x4c4   : > { %v1566_v33 = vpop.xlane.xlu0 %1565 }
 0x4c7   : > { %3052 = vmatmul.msk.f32.gmra.mxu2 %vm503_vm0, %v746_v6 }
 0x4d4   : > { %v1568_v28 = vpop.xlane.xlu0 %1567 }
 0x4e4   : > { %v1570_v10 = vpop.xlane.xlu0 %1569 }
 0x4e5   : > { %3218 = vrcp.f32 %v1570_v10 }
 0x4e6   : > { %3220 = vrcp.f32 %v1568_v28 }
 0x4e7   : > { %3222 = vrcp.f32 %v1566_v33 }
 0x4e8   : > { %3224 = vrcp.f32 %v1564_v56  ;;  %v747_v56 = vld [vmem:[%s4748_s7 + $0x108] sm:$0xff] }
 0x4e9   : > { %3226 = vrcp.f32 %v1562_v0  ;;  %3053 = vmatmul.msk.f32.gmra.mxu2 %vm503_vm0, %v747_v56 }
 0x4ea   : > { %3228 = vrcp.f32 %v4046_v22 }
 0x4eb   : > { %v3219_v54 = vpop.eup %3218 }
 0x4ec   : > { %v1558_v31 = vpop.xlane.xlu0 %1557  ;;  %v1602_v60 = vmul.f32 %v3219_v54, %v3984_v18  ;;  %v3221_v43 = vpop.eup %3220 }
 0x4ed   : > { %v1601_v4 = vmul.f32 %v3221_v43, %v3972_v55  ;;  %v3223_v53 = vpop.eup %3222 }
 0x4ee   : > { %1603 = vmatpush.xpose.msrb.mxu0 %v1602_v60  ;;  %v1600_v30 = vmul.f32 %v3223_v53, %v3967_v2  ;;  %v3225_v33 = vpop.eup %3224  ;;  %v1550_v2 = vpop.xlane.xlu1 %1549 }
 0x4ef   : > { %v1599_v55 = vmul.f32 %v3225_v33, %v3955_v57  ;;  %v3227_v0 = vpop.eup %3226  ;;  %v748_v57 = vld [vmem:[%s4748_s7 + $0x110] sm:$0xff] }
 0x4f0   : > { %v1598_v10 = vmul.f32 %v3227_v0, %v3950_v62  ;;  %v3229_v1 = vpop.eup %3228 }
 0x4f1   : > { %3054 = vmatmul.msk.f32.gmra.mxu2 %vm503_vm0, %v748_v57 }
 0x4f2   : > { %1604 = vmatpush.xpose.msrb.mxu0 %v1601_v4 }
 0x4f4   : > { %v1820_v59 = vpop.xlane.xlu0 %1819  ;;  %v4121_v36 = vpop.xlane.xlu2 %1919 }
 0x4f5   : > { %v1848_v18 = vsub.f32 %v3999_v16, %v1820_v59 }
 0x4f6   : > { %1605 = vmatpush.xpose.msrb.mxu0 %v1600_v30 }
 0x4f7   : > { %v1867_v32 = vmul.f32 1.442695, %v1848_v18  ;;  %v749_v18 = vld [vmem:[%s4748_s7 + $0x118] sm:$0xff] }
 0x4f9   : > { %3230 = vpow2.f32 %v1867_v32  ;;  %3055 = vmatmul.msk.f32.gmra.mxu2 %vm503_vm0, %v749_v18 }
 0x4fa   : > { %1606 = vmatpush.xpose.msrb.mxu0 %v1599_v55  ;;  %3232 = vrcp.f32 %v1558_v31  ;;  %v1597_v31 = vmul.f32 %v3229_v1, %v3891_v23 }
 0x4fb   : > { %3234 = vrcp.f32 %v1556_v13  ;;  %v1548_v13 = vpop.xlane.xlu1 %1547 }
 0x4fc   : > { %v1818_v16 = vpop.xlane.xlu0 %1817  ;;  %v4131_v28 = vpop.xlane.xlu2 %1921 }
 0x4fd   : > { %v1847_v12 = vsub.f32 %v4011_v35, %v1818_v16 }
 0x4fe   : > { %1607 = vmatpush.xpose.msrb.mxu0 %v1598_v10 }
 0x4ff   : > { %v4135_v54 = vpop.eup %3230  ;;  %v1865_v22 = vmul.f32 1.442695, %v1847_v12  ;;  %v751_v12 = vld [vmem:[%s4748_s7 + $0x128] sm:$0xff] }
 0x500   : > { %1899 = vadd.xlane.f32.xlu0 %v4135_v54  ;;  %v3233_v35 = vpop.eup %3232 }
 0x501   : > { %3236 = vpow2.f32 %v1865_v22  ;;  %v1596_v6 = vmul.f32 %v3233_v35, %v3990_v20  ;;  %v3235_v4 = vpop.eup %3234  ;;  %v752_v35 = vld [vmem:[%s4748_s7 + $0x130] sm:$0xff] }
 0x502   : > { %1608 = vmatpush.xpose.msrb.mxu0 %v1597_v31  ;;  %3238 = vrcp.f32 %v1554_v29  ;;  %v1595_v23 = vmul.f32 %v3235_v4, %v3903_v37 }
 0x503   : > { %3240 = vrcp.f32 %v1552_v47  ;;  %v750_v47 = vld [vmem:[%s4748_s7 + $0x120] sm:$0xff]  ;;  %v1916_v55 = vpop.xlane.xlu1 %1915 }
 0x504   : > { %v1816_v62 = vpop.xlane.xlu0 %1815  ;;  %v1924_v60 = vpop.xlane.xlu2 %1923  ;;  %3056 = vmatmul.msk.f32.gmra.mxu2 %vm503_vm0, %v750_v47 }
 0x505   : > { %v1846_v43 = vsub.f32 %v4020_v40, %v1816_v62 }
 0x506   : > { %1609 = vmatpush.xpose.msrb.mxu0 %v1596_v6 }
 0x507   : > { %v4145_v53 = vpop.eup %3236  ;;  %v1863_v59 = vmul.f32 1.442695, %v1846_v43 }
 0x508   : > { %1897 = vadd.xlane.f32.xlu1 %v4145_v53  ;;  %v3239_v40 = vpop.eup %3238 }
 0x509   : > { %3242 = vpow2.f32 %v1863_v59  ;;  %v1594_v33 = vmul.f32 %v3239_v40, %v3912_v49  ;;  %v3241_v32 = vpop.eup %3240 }
 0x50a   : > { %1610 = vmatpush.xpose.msrb.mxu0 %v1595_v23  ;;  %3244 = vrcp.f32 %v1550_v2  ;;  %v1593_v37 = vmul.f32 %v3241_v32, %v3920_v8  ;;  %v995_v23 = vpop.f32.mrf.mxu2 }
 0x50b   : > { %3246 = vrcp.f32 %v1548_v13  ;;  %v1542_v8 = vpop.xlane.xlu1 %1541 }
 0x50c   : > { %v1814_v20 = vpop.xlane.xlu0 %1813  ;;  %v1918_v29 = vpop.xlane.xlu2 %1917  ;;  %3057 = vmatmul.msk.f32.gmra.mxu2 %vm503_vm0, %v751_v12 }
 0x50d   : > { %v1845_v30 = vsub.f32 %v4032_v3, %v1814_v20 }
 0x50e   : > { %1611 = vmatpush.xpose.msrb.mxu0 %v1594_v33  ;;  %v947_v33 = vpop.f32.mrf.mxu0 }
 0x50f   : > { %v4158_v56 = vpop.eup %3242  ;;  %v1861_v0 = vmul.f32 1.442695, %v1845_v30 }
 0x510   : > { %1895 = vadd.xlane.f32.xlu2 %v4158_v56  ;;  %v3245_v3 = vpop.eup %3244 }
 0x511   : > { %3248 = vpow2.f32 %v1861_v0  ;;  %v1592_v2 = vmul.f32 %v3245_v3, %v3928_v21  ;;  %v3247_v10 = vpop.eup %3246 }
 0x512   : > { %1612 = vmatpush.xpose.msrb.mxu0 %v1593_v37  ;;  %v1591_v22 = vmul.f32 %v3247_v10, %v3937_v26 }
 0x514   : > { %v1546_v49 = vpop.xlane.xlu0 %1545  ;;  %v1544_v16 = vpop.xlane.xlu2 %1543  ;;  %3058 = vmatmul.msk.f32.gmra.mxu2 %vm503_vm0, %v752_v35 }
 0x515   : > { %3250 = vrcp.f32 %v1546_v49 }
 0x516   : > { %1613 = vmatpush.xpose.msrb.mxu0 %v1592_v2  ;;  %3252 = vrcp.f32 %v1544_v16 }
 0x517   : > { %v4167_v1 = vpop.eup %3248  ;;  %3254 = vrcp.f32 %v1542_v8 }
 0x518   : > { %1893 = vadd.xlane.f32.xlu0 %v4167_v1  ;;  %3256 = vrcp.f32 %v1924_v60 }
 0x51a   : > { %1614 = vmatpush.xpose.msrb.mxu0 %v1591_v22 }
 0x51b   : > { %v3251_v57 = vpop.eup %3250 }
 0x51c   : > { %v1914_v21 = vpop.xlane.xlu0 %1913  ;;  %v1590_v31 = vmul.f32 %v3251_v57, %v4048_v5  ;;  %v3253_v62 = vpop.eup %3252  ;;  %v753_v5 = vld [vmem:[%s4748_s7 + $0x138] sm:$0xff] }
 0x51d   : > { %v1589_v43 = vmul.f32 %v3253_v62, %v4050_v51  ;;  %v3255_v6 = vpop.eup %3254  ;;  %3059 = vmatmul.msk.f32.gmra.mxu2 %vm503_vm0, %v753_v5  ;;  %v1912_v30 = vpop.xlane.xlu2 %1911 }
 0x51e   : > { %1615 = vmatpush.xpose.msrb.mxu0 %v1590_v31  ;;  %v1588_v4 = vmul.f32 %v3255_v6, %v3982_v24  ;;  %v3257_v13 = vpop.eup %3256 }
 0x51f   : > { %v1956_v60 = vmul.f32 %v3257_v13, %v4022_v58 }
 0x522   : > { %1616 = vmatpush.xpose.msrb.mxu0 %v1589_v43 }
 0x524   : > { %v1540_v26 = vpop.xlane.xlu0 %1539 }
 0x525   : > { %3258 = vrcp.f32 %v1540_v26 }
 0x526   : > { %1617 = vmatpush.xpose.msrb.mxu0 %v1588_v4  ;;  %3260 = vrcp.f32 %v4131_v28 }
 0x527   : > { %3262 = vrcp.f32 %v4121_v36 }
 0x528   : > { %3264 = vrcp.f32 %v1918_v29  ;;  %v1910_v29 = vpop.xlane.xlu1 %1909 }
 0x529   : > { %3266 = vrcp.f32 %v1916_v55 }
 0x52a   : > { %3268 = vrcp.f32 %v1914_v21 }
 0x52b   : > { %v3259_v59 = vpop.eup %3258  ;;  %3270 = vrcp.f32 %v1912_v30 }
 0x52c   : > { %v1587_v51 = vmul.f32 %v3259_v59, %v4075_v42  ;;  %v3261_v18 = vpop.eup %3260  ;;  %v998_v42 = vpop.f32.mrf.mxu2  ;;  %3272 = vrcp.f32 %v1910_v29 }
 0x52d   : > { %v1955_v24 = vmul.f32 %v3261_v18, %v4013_v25  ;;  %v3263_v40 = vpop.eup %3262 }
 0x52e   : > { %1618 = vmatpush.xpose.msrb.mxu0 %v1587_v51  ;;  %v1954_v28 = vmul.f32 %v3263_v40, %v4001_v9  ;;  %v3265_v20 = vpop.eup %3264  ;;  %v1908_v9 = vpop.xlane.xlu2 %1907 }
 0x52f   : > { %v1953_v58 = vmul.f32 %v3265_v20, %v4034_v14  ;;  %v3267_v36 = vpop.eup %3266  ;;  %3274 = vrcp.f32 %v1908_v9  ;;  %v1906_v14 = vpop.xlane.xlu0 %1905 }
 0x530   : > { %v1952_v25 = vmul.f32 %v3267_v36, %v3977_v19  ;;  %v3269_v32 = vpop.eup %3268  ;;  %v950_v19 = vpop.f32.mrf.mxu0  ;;  %3276 = vrcp.f32 %v1906_v14 }
 0x531   : > { %v1951_v47 = vmul.f32 %v3269_v32, %v4068_v45  ;;  %v1904_v3 = vpop.xlane.xlu1 %1903 }
 0x532   : > { %1957 = vmatpush.xpose.msra.mxu0 %v1956_v60  ;;  %3278 = vrcp.f32 %v1904_v3 }
 0x534   : > { %v1001_v55 = vpop.f32.mrf.mxu2 }
 0x536   : > { %1958 = vmatpush.xpose.msra.mxu0 %v1955_v24  ;;  %v1902_v16 = vpop.xlane.xlu2 %1901 }
 0x537   : > { %3280 = vrcp.f32 %v1902_v16 }
 0x539   : > { %2344 = vxpose.xlu2.b32.start [1/4] (short) %v3732_v44, 128  ;;  %v3271_v44 = vpop.eup %3270 }
 0x53a   : > { %1959 = vmatpush.xpose.msra.mxu0 %v1954_v28  ;;  %v1950_v0 = vmul.f32 %v3271_v44, %v4066_v39  ;;  %v3273_v37 = vpop.eup %3272 }
 0x53b   : > { %v1949_v49 = vmul.f32 %v3273_v37, %v3992_v61 }
 0x53c   : > { %v1004_v45 = vpop.f32.mrf.mxu2 }
 0x53d   : > { %2082 = vmatpush.msra.mxu3 %v1004_v45 }
 0x53e   : > { %1960 = vmatpush.xpose.msra.mxu0 %v1953_v58 }
 0x53f   : > { %2083 = vmatpush.msra.mxu3 %v1001_v55 }
 0x541   : > { %2345 = vxpose.xlu2.b32.cont [2/4] (short) %v3734_v46, 128  ;;  %v3275_v46 = vpop.eup %3274  ;;  %2084 = vmatpush.msra.mxu3 %v998_v42 }
 0x542   : > { %1961 = vmatpush.xpose.msra.mxu0 %v1952_v25  ;;  %1990 = vxpose.xlu1.b32.start [1/4] (short) %v947_v33, 128  ;;  %v1948_v2 = vmul.f32 %v3275_v46, %v4077_v63  ;;  %v3277_v39 = vpop.eup %3276 }
 0x543   : > { %2085 = vmatpush.msra.mxu3 %v995_v23  ;;  %v3279_v61 = vpop.eup %3278 }
 0x544   : > { %v1007_v12 = vpop.f32.mrf.mxu2  ;;  %v1946_v10 = vmul.f32 %v3279_v61, %v4003_v27  ;;  %v3281_v8 = vpop.eup %3280 }
 0x545   : > { %v1945_v63 = vmul.f32 %v3281_v8, %v4087_v34 }
 0x546   : > { %1962 = vmatpush.xpose.msra.mxu0 %v1951_v47 }
 0x549   : > { %2346 = vxpose.xlu2.b32.cont [3/4] (short) %v3736_v48, 128  ;;  %v1947_v48 = vmul.f32 %v3277_v39, %v4085_v7 }
 0x54a   : > { %1963 = vmatpush.xpose.msra.mxu0 %v1950_v0  ;;  %1991 = vxpose.xlu1.b32.cont [2/4] (short) %v950_v19, 128 }
 0x54c   : > { %v1010_v22 = vpop.f32.mrf.mxu2 }
 0x54e   : > { %1964 = vmatpush.xpose.msra.mxu0 %v1949_v49 }
 0x551   : > { %2347 = vxpose.xlu2.b32.end [4/4] (short) %v3738_v50, 128 }
 0x552   : > { %1965 = vmatpush.xpose.msra.mxu0 %v1948_v2  ;;  %1992 = vxpose.xlu1.b32.cont [3/4] (short) %v3720_v38, 128 }
 0x554   : > { %v1013_v57 = vpop.f32.mrf.mxu2 }
 0x556   : > { %1966 = vmatpush.xpose.msra.mxu0 %v1947_v48 }
 0x55a   : > { %1967 = vmatpush.xpose.msra.mxu0 %v1946_v10  ;;  %1993 = vxpose.xlu1.b32.end [4/4] (short) %v3726_v41, 128 }
 0x55c   : > { %v1016_v50 = vpop.f32.mrf.mxu2 }
 0x55e   : > { %1968 = vmatpush.xpose.msra.mxu0 %v1945_v63 }
 0x564   : > { %v1019_v7 = vpop.f32.mrf.mxu2 }
 0x565   : > { %1619 = vmatmul.f32.vlgmr.msrb.gmra.mxu0 %v1019_v7 }
 0x56c   : > { %v1022_v62 = vpop.f32.mrf.mxu2 }
 0x56d   : > { %1622 = vmatmul.f32.gmra.mxu0 %v1022_v62 }
 0x573   : > { %v1900_v21 = vpop.xlane.xlu0 %1899 }
 0x574   : > { %3282 = vrcp.f32 %v1900_v21  ;;  %v1025_v43 = vpop.f32.mrf.mxu2 }
 0x575   : > { %1625 = vmatmul.f32.gmra.mxu0 %v1025_v43 }
 0x57a   : > { %v3283_v31 = vpop.eup %3282 }
 0x57b   : > { %v1898_v38 = vpop.xlane.xlu1 %1897  ;;  %v1944_v35 = vmul.f32 %v3283_v31, %v4135_v54 }
 0x57c   : > { %3284 = vrcp.f32 %v1898_v38  ;;  %v1028_v5 = vpop.f32.mrf.mxu2 }
 0x57d   : > { %1969 = vmatpush.xpose.msra.mxu0 %v1944_v35 }
 0x57e   : > { %1628 = vmatmul.f32.gmra.mxu0 %v1028_v5 }
 0x582   : > { %v3285_v27 = vpop.eup %3284 }
 0x583   : > { %v1896_v34 = vpop.xlane.xlu2 %1895  ;;  %v1943_v41 = vmul.f32 %v3285_v27, %v4145_v53 }
 0x584   : > { %3286 = vrcp.f32 %v1896_v34 }
 0x585   : > { %1970 = vmatpush.xpose.msra.mxu0 %v1943_v41 }
 0x587   : > { %v1031_v59 = vpop.f32.mrf.mxu2 }
 0x58a   : > { %v3287_v6 = vpop.eup %3286 }
 0x58b   : > { %v1894_v26 = vpop.xlane.xlu0 %1893  ;;  %v1942_v4 = vmul.f32 %v3287_v6, %v4158_v56 }
 0x58c   : > { %3288 = vrcp.f32 %v1894_v26 }
 0x58d   : > { %1971 = vmatpush.xpose.msra.mxu0 %v1942_v4 }
 0x58f   : > { %v1034_v53 = vpop.f32.mrf.mxu2 }
 0x592   : > { %v3289_v54 = vpop.eup %3288 }
 0x593   : > { %v1941_v13 = vmul.f32 %v3289_v54, %v4167_v1 }
 0x595   : > { %1972 = vmatpush.xpose.msra.mxu0 %v1941_v13 }
 0x597   : > { %v1037_v51 = vpop.f32.mrf.mxu2 }
 0x598   : > { %1973 = vmatmul.f32.vlgmr.msra.gmra.mxu0 %v1031_v59 }
 0x599   : > { %2436 = vmatpush.msrb.mxu0 %v1016_v50 }
 0x59b   : > { %2437 = vmatpush.msrb.mxu0 %v1013_v57 }
 0x59d   : > { %2438 = vmatpush.msrb.mxu0 %v1010_v22 }
 0x59f   : > { %2439 = vmatpush.msrb.mxu0 %v1007_v12 }
 0x5a0   : > { %1976 = vmatmul.f32.gmra.mxu0 %v1034_v53  ;;  %v1040_v60 = vpop.f32.mrf.mxu2 }
 0x5a8   : > { %1979 = vmatmul.f32.gmra.mxu0 %v1037_v51 }
 0x5b0   : > { %1982 = vmatmul.f32.gmra.mxu0 %v1040_v60 }
 0x5d2   : > { %v2360_v56 = vpop.trf.xlu2 }
 0x5d3   : > { %3116 = vmatmul.msk.f32.vlgmr.msrb.gmra.mxu0 %vm503_vm0, %v2360_v56 }
 0x5da   : > { %v2361_v18 = vpop.trf.xlu2 }
 0x5db   : > { %3117 = vmatmul.msk.f32.gmra.mxu0 %vm503_vm0, %v2361_v18 }
 0x5e2   : > { %v2362_v1 = vpop.trf.xlu2  ;;  %v4218_v42 = vpop.f32.mrf.mxu0 }
 0x5e3   : > { %3118 = vmatmul.msk.f32.gmra.mxu0 %vm503_vm0, %v2362_v1 }
 0x5e6   : > { %v2006_v24 = vpop.trf.xlu1 }
 0x5e7   : > { %3100 = vmatmul.msk.f32.vlgmr.msra.gmra.mxu3 %vm503_vm0, %v2006_v24 }
 0x5ea   : > { %v2363_v23 = vpop.trf.xlu2  ;;  %v4222_v33 = vpop.f32.mrf.mxu0 }
 0x5eb   : > { %3119 = vmatmul.msk.f32.gmra.mxu0 %vm503_vm0, %v2363_v23 }
 0x5ee   : > { %v2007_v40 = vpop.trf.xlu1 }
 0x5ef   : > { %3101 = vmatmul.msk.f32.gmra.mxu3 %vm503_vm0, %v2007_v40 }
 0x5f2   : > { %v2364_v28 = vpop.trf.xlu2  ;;  %v4227_v47 = vpop.f32.mrf.mxu0 }
 0x5f3   : > { %3120 = vmatmul.msk.f32.gmra.mxu0 %vm503_vm0, %v2364_v28 }
 0x5f6   : > { %v2008_v20 = vpop.trf.xlu1 }
 0x5f7   : > { %3102 = vmatmul.msk.f32.gmra.mxu3 %vm503_vm0, %v2008_v20 }
 0x5fa   : > { %v2365_v30 = vpop.trf.xlu2 }
 0x5fb   : > { %3121 = vmatmul.msk.f32.gmra.mxu0 %vm503_vm0, %v2365_v30  ;;  %v4231_v0 = vpop.f32.mrf.mxu0 }
 0x5fe   : > { %v2009_v58 = vpop.trf.xlu1 }
 0x5ff   : > { %3103 = vmatmul.msk.f32.gmra.mxu3 %vm503_vm0, %v2009_v58 }
 0x602   : > { %v2366_v36 = vpop.trf.xlu2 }
 0x603   : > { %3122 = vmatmul.msk.f32.gmra.mxu0 %vm503_vm0, %v2366_v36 }
 0x606   : > { %v2010_v29 = vpop.trf.xlu1 }
 0x607   : > { %3104 = vmatmul.msk.f32.gmra.mxu3 %vm503_vm0, %v2010_v29 }
 0x60a   : > { %v2367_v25 = vpop.trf.xlu2 }
 0x60b   : > { %3123 = vmatmul.msk.f32.gmra.mxu0 %vm503_vm0, %v2367_v25 }
 0x60e   : > { %v2011_v32 = vpop.trf.xlu1 }
 0x60f   : > { %3105 = vmatmul.msk.f32.gmra.mxu3 %vm503_vm0, %v2011_v32 }
 0x612   : > { %v2368_v9 = vpop.trf.xlu2 }
 0x613   : > { %3124 = vmatmul.msk.f32.gmra.mxu0 %vm503_vm0, %v2368_v9 }
 0x615   : > { %v4236_v3 = vpop.f32.mrf.mxu0 }
 0x616   : > { %v2012_v55 = vpop.trf.xlu1 }
 0x617   : > { %3106 = vmatmul.msk.f32.gmra.mxu3 %vm503_vm0, %v2012_v55 }
 0x61a   : > { %v2369_v44 = vpop.trf.xlu2 }
 0x61b   : > { %3125 = vmatmul.msk.f32.gmra.mxu0 %vm503_vm0, %v2369_v44 }
 0x61d   : > { %v4240_v16 = vpop.f32.mrf.mxu0 }
 0x61e   : > { %v2013_v14 = vpop.trf.xlu1 }
 0x61f   : > { %3107 = vmatmul.msk.f32.gmra.mxu3 %vm503_vm0, %v2013_v14 }
 0x622   : > { %v2370_v37 = vpop.trf.xlu2 }
 0x623   : > { %3126 = vmatmul.msk.f32.gmra.mxu0 %vm503_vm0, %v2370_v37 }
 0x625   : > { %v4245_v48 = vpop.f32.mrf.mxu0 }
 0x626   : > { %v2014_v19 = vpop.trf.xlu1 }
 0x627   : > { %3108 = vmatmul.msk.f32.gmra.mxu3 %vm503_vm0, %v2014_v19 }
 0x62a   : > { %v2371_v49 = vpop.trf.xlu2 }
 0x62b   : > { %3127 = vmatmul.msk.f32.gmra.mxu0 %vm503_vm0, %v2371_v49 }
 0x62d   : > { %v4249_v8 = vpop.f32.mrf.mxu0 }
 0x62e   : > { %v2015_v46 = vpop.trf.xlu1 }
 0x62f   : > { %3109 = vmatmul.msk.f32.gmra.mxu3 %vm503_vm0, %v2015_v46 }
 0x632   : > { %v2372_v45 = vpop.trf.xlu2 }
 0x633   : > { %3128 = vmatmul.msk.f32.gmra.mxu0 %vm503_vm0, %v2372_v45 }
 0x636   : > { %v2016_v2 = vpop.trf.xlu1 }
 0x637   : > { %3110 = vmatmul.msk.f32.gmra.mxu3 %vm503_vm0, %v2016_v2 }
 0x63a   : > { %v2373_v39 = vpop.trf.xlu2 }
 0x63b   : > { %3129 = vmatmul.msk.f32.gmra.mxu0 %vm503_vm0, %v2373_v39 }
 0x63e   : > { %v2017_v61 = vpop.trf.xlu1 }
 0x63f   : > { %3111 = vmatmul.msk.f32.gmra.mxu3 %vm503_vm0, %v2017_v61 }
 0x642   : > { %v2374_v12 = vpop.trf.xlu2 }
 0x643   : > { %3130 = vmatmul.msk.f32.gmra.mxu0 %vm503_vm0, %v2374_v12 }
 0x646   : > { %v2018_v10 = vpop.trf.xlu1 }
 0x647   : > { %3112 = vmatmul.msk.f32.gmra.mxu3 %vm503_vm0, %v2018_v10 }
 0x64a   : > { %v2375_v12 = vpop.trf.xlu2 }
 0x64b   : > { %3131 = vmatmul.msk.f32.gmra.mxu0 %vm503_vm0, %v2375_v12 }
 0x64e   : > { %v2019_v63 = vpop.trf.xlu1 }
 0x64f   : > { %3113 = vmatmul.msk.f32.gmra.mxu3 %vm503_vm0, %v2019_v63 }
 0x650   : > { %v2441_v22 = vpop.f32.mrf.mxu0 }
 0x651   : > { %v2489_v19 = vmul.f32 0.17677669, %v2441_v22 }
 0x653   : > { %v4303_v46 = vadd.f32 %v2489_v19, %v3811_v11 }
 0x656   : > { %v2020_v57 = vpop.trf.xlu1 }
 0x657   : > { %3114 = vmatmul.msk.f32.gmra.mxu3 %vm503_vm0, %v2020_v57 }
 0x658   : > { %v2444_v50 = vpop.f32.mrf.mxu0 }
 0x659   : > { %v2490_v44 = vmul.f32 0.17677669, %v2444_v50 }
 0x65b   : > { %v4299_v14 = vadd.f32 %v2490_v44, %v3811_v11 }
 0x65e   : > { %v2021_v21 = vpop.trf.xlu1 }
 0x65f   : > { %3115 = vmatmul.msk.f32.gmra.mxu3 %vm503_vm0, %v2021_v21 }
 0x660   : > { %v2447_v7 = vpop.f32.mrf.mxu0 }
 0x661   : > { %v2491_v32 = vmul.f32 0.17677669, %v2447_v7 }
 0x663   : > { %v4295_v9 = vadd.f32 %v2491_v32, %v3811_v11 }
 0x668   : > { %v2450_v31 = vpop.f32.mrf.mxu0 }
 0x669   : > { %v2492_v36 = vmul.f32 0.17677669, %v2450_v31 }
 0x66a   : > { %v4255_v38 = vpop.f32.mrf.mxu3 }
 0x66b   : > { %v4291_v29 = vadd.f32 %v2492_v36, %v3811_v11 }
 0x670   : > { %v4257_v35 = vpop.f32.mrf.mxu0 }
 0x672   : > { %v4259_v62 = vpop.f32.mrf.mxu3 }
 0x678   : > { %v4261_v27 = vpop.f32.mrf.mxu0 }
 0x67a   : > { %v4263_v34 = vpop.f32.mrf.mxu3 }
 0x680   : > { %v4265_v41 = vpop.f32.mrf.mxu0 }
 0x682   : > { %v4267_v43 = vpop.f32.mrf.mxu3 }
 0x688   : > { %v4269_v6 = vpop.f32.mrf.mxu0 }
 0x68a   : > { %v4271_v26 = vpop.f32.mrf.mxu3 }
 0x690   : > { %v4273_v4 = vpop.f32.mrf.mxu0 }
 0x692   : > { %v4275_v5 = vpop.f32.mrf.mxu3 }
 0x698   : > { %v4277_v54 = vpop.f32.mrf.mxu0 }
 0x69a   : > { %v2105_v13 = vpop.f32.mrf.mxu3 }
 0x6a0   : > { %v4279_v59 = vpop.f32.mrf.mxu0 }
 0x6a2   : > { %v2108_v53 = vpop.f32.mrf.mxu3 }
 0x6a3   : > { %v2142_v51 = vmul.f32 0.17677669, %v2108_v53 }
 0x6a5   : > { %v2158_v60 = vadd.f32 %v2142_v51, %v3811_v11 }
 0x6a7   : > { %2181 = vmax.xlane.f32.xlu2 %v2158_v60 }
 0x6a8   : > { %v4282_v56 = vpop.f32.mrf.mxu0 }
 0x6aa   : > { %v2111_v18 = vpop.f32.mrf.mxu3 }
 0x6b0   : > { %v4284_v1 = vpop.f32.mrf.mxu0 }
 0x6b2   : > { %v2114_v24 = vpop.f32.mrf.mxu3 }
 0x6b3   : > { %v2144_v53 = vmul.f32 0.17677669, %v2114_v24 }
 0x6b5   : > { %v4329_v51 = vadd.f32 %v2144_v53, %v3786_v52  ;;  %v2499_v53 = vmul.f32 0.17677669, %v4279_v59 }
 0x6b8   : > { %v2480_v23 = vpop.f32.mrf.mxu0 }
 0x6ba   : > { %v2117_v40 = vpop.f32.mrf.mxu3 }
 0x6bb   : > { %v2145_v7 = vmul.f32 0.17677669, %v2117_v40  ;;  %v2141_v40 = vmul.f32 0.17677669, %v2105_v13  ;;  %v2139_v13 = vmul.f32 0.17677669, %v4271_v26 }
 0x6bc   : > { %v2500_v26 = vmul.f32 0.17677669, %v4282_v56 }
 0x6bd   : > { %v4325_v31 = vadd.f32 %v2145_v7, %v3786_v52  ;;  %v2157_v24 = vadd.f32 %v2141_v40, %v3811_v11 }
 0x6c0   : > { %v2483_v28 = vpop.f32.mrf.mxu0 }
 0x6c1   : > { %v2503_v20 = vmul.f32 0.17677669, %v2483_v28  ;;  %v2143_v28 = vmul.f32 0.17677669, %v2111_v18 }
 0x6c2   : > { %v2120_v30 = vpop.f32.mrf.mxu3 }
 0x6c3   : > { %v4287_v58 = vadd.f32 %v2503_v20, %v3786_v52  ;;  %v2146_v50 = vmul.f32 0.17677669, %v2120_v30  ;;  %v4333_v36 = vadd.f32 %v2143_v28, %v3786_v52 }
 0x6c5   : > { %2549 = vmax.xlane.f32.xlu1 %v4287_v58  ;;  %v4321_v21 = vadd.f32 %v2146_v50, %v3786_v52 }
 0x6ca   : > { %v2123_v25 = vpop.f32.mrf.mxu3 }
 0x6cb   : > { %v2147_v22 = vmul.f32 0.17677669, %v2123_v25 }
 0x6cd   : > { %2527 = vmax.xlane.f32.xlu1 %v4291_v29  ;;  %v4317_v57 = vadd.f32 %v2147_v22, %v3786_v52 }
 0x6d2   : > { %v2126_v55 = vpop.f32.mrf.mxu3 }
 0x6d3   : > { %v2148_v10 = vmul.f32 0.17677669, %v2126_v55  ;;  %v2140_v55 = vmul.f32 0.17677669, %v4275_v5  ;;  %v2501_v5 = vmul.f32 0.17677669, %v4284_v1 }
 0x6d5   : > { %2525 = vmax.xlane.f32.xlu1 %v4295_v9  ;;  %v4313_v63 = vadd.f32 %v2148_v10, %v3786_v52  ;;  %v4342_v18 = vadd.f32 %v2140_v55, %v3811_v11  ;;  %v4356_v19 = vadd.f32 %v2501_v5, %v3786_v52  ;;  %v2498_v55 = vmul.f32 0.17677669, %v4277_v54 }
 0x6d7   : > { %v4396_v5 = vadd.f32 %v2498_v55, %v3786_v52 }
 0x6da   : > { %v2129_v37 = vpop.f32.mrf.mxu3 }
 0x6db   : > { %v2149_v39 = vmul.f32 0.17677669, %v2129_v37  ;;  %v4351_v37 = vadd.f32 %v2139_v13, %v3811_v11 }
 0x6dd   : > { %2523 = vmax.xlane.f32.xlu1 %v4299_v14  ;;  %v4308_v61 = vadd.f32 %v2149_v39, %v3786_v52 }
 0x6e2   : > { %v2132_v49 = vpop.f32.mrf.mxu3 }
 0x6e3   : > { %v2150_v45 = vmul.f32 0.17677669, %v2132_v49 }
 0x6e5   : > { %2521 = vmax.xlane.f32.xlu1 %v4303_v46  ;;  %v2166_v2 = vadd.f32 %v2150_v45, %v3786_v52  ;;  %v4366_v45 = vadd.f32 %v2500_v26, %v3786_v52  ;;  %v2135_v26 = vmul.f32 0.17677669, %v4255_v38 }
 0x6e7   : > { %2197 = vmax.xlane.f32.xlu0 %v2166_v2  ;;  %v4406_v54 = vadd.f32 %v2135_v26, %v3811_v11 }
 0x6ef   : > { %2195 = vmax.xlane.f32.xlu0 %v4308_v61 }
 0x6f7   : > { %2193 = vmax.xlane.f32.xlu0 %v4313_v63 }
 0x6ff   : > { %2191 = vmax.xlane.f32.xlu0 %v4317_v57 }
 0x707   : > { %2189 = vmax.xlane.f32.xlu0 %v4321_v21 }
 0x70f   : > { %2187 = vmax.xlane.f32.xlu0 %v4325_v31 }
 0x717   : > { %2185 = vmax.xlane.f32.xlu0 %v4329_v51 }
 0x71a   : > { %v2182_v20 = vpop.xlane.xlu2 %2181 }
 0x71b   : > { %v2206_v30 = vsub.f32 %v2158_v60, %v2182_v20  ;;  %v2502_v60 = vmul.f32 0.17677669, %v2480_v23  ;;  %v2138_v23 = vmul.f32 0.17677669, %v4267_v43  ;;  %v2137_v43 = vmul.f32 0.17677669, %v4263_v34 }
 0x71c   : > { %v4380_v20 = vadd.f32 %v2499_v53, %v3786_v52 }
 0x71d   : > { %v2229_v25 = vmul.f32 1.442695, %v2206_v30  ;;  %v4346_v44 = vadd.f32 %v2502_v60, %v3786_v52  ;;  %v4361_v49 = vadd.f32 %v2138_v23, %v3811_v11  ;;  %v4374_v7 = vadd.f32 %v2137_v43, %v3811_v11 }
 0x71f   : > { %3290 = vpow2.f32 %v2229_v25  ;;  %2183 = vmax.xlane.f32.xlu0 %v4333_v36  ;;  %v2136_v25 = vmul.f32 0.17677669, %v4259_v62 }
 0x725   : > { %v4336_v32 = vpop.eup %3290 }
 0x726   : > { %2261 = vadd.xlane.f32.xlu2 %v4336_v32 }
 0x727   : > { %2179 = vmax.xlane.f32.xlu0 %v2157_v24 }
 0x72f   : > { %2177 = vmax.xlane.f32.xlu0 %v4342_v18 }
 0x737   : > { %2547 = vmax.xlane.f32.xlu0 %v4346_v44 }
 0x73f   : > { %2175 = vmax.xlane.f32.xlu0 %v4351_v37 }
 0x747   : > { %2545 = vmax.xlane.f32.xlu0 %v4356_v19 }
 0x74f   : > { %2173 = vmax.xlane.f32.xlu0 %v4361_v49 }
 0x757   : > { %2543 = vmax.xlane.f32.xlu0 %v4366_v45 }
 0x75a   : > { %v2198_v1 = vpop.xlane.xlu0 %2197 }
 0x75b   : > { %v2214_v39 = vsub.f32 %v2166_v2, %v2198_v1 }
 0x75d   : > { %v2245_v12 = vmul.f32 1.442695, %v2214_v39 }
 0x75f   : > { %3292 = vpow2.f32 %v2245_v12 }
 0x762   : > { %v2196_v10 = vpop.xlane.xlu0 %2195 }
 0x763   : > { %v2213_v56 = vsub.f32 %v4308_v61, %v2196_v10  ;;  %v4388_v61 = vadd.f32 %v2136_v25, %v3811_v11  ;;  %v2497_v10 = vmul.f32 0.17677669, %v4273_v4 }
 0x765   : > { %v4369_v22 = vpop.eup %3292  ;;  %v2243_v28 = vmul.f32 1.442695, %v2213_v56  ;;  %v4413_v53 = vadd.f32 %v2497_v10, %v3786_v52 }
 0x766   : > { %2277 = vadd.xlane.f32.xlu0 %v4369_v22 }
 0x767   : > { %3294 = vpow2.f32 %v2243_v28  ;;  %v2496_v28 = vmul.f32 0.17677669, %v4269_v6 }
 0x76a   : > { %v2194_v50 = vpop.xlane.xlu0 %2193 }
 0x76b   : > { %v2212_v59 = vsub.f32 %v4313_v63, %v2194_v50 }
 0x76d   : > { %v4383_v34 = vpop.eup %3294  ;;  %v2241_v13 = vmul.f32 1.442695, %v2212_v59 }
 0x76e   : > { %2171 = vmax.xlane.f32.xlu0 %v4374_v7 }
 0x76f   : > { %3296 = vpow2.f32 %v2241_v13  ;;  %v4431_v13 = vadd.f32 %v2496_v28, %v3811_v11 }
 0x772   : > { %v2192_v2 = vpop.xlane.xlu0 %2191 }
 0x773   : > { %v2211_v12 = vsub.f32 %v4317_v57, %v2192_v2 }
 0x775   : > { %v4401_v23 = vpop.eup %3296  ;;  %v2239_v43 = vmul.f32 1.442695, %v2211_v12 }
 0x776   : > { %2541 = vmax.xlane.f32.xlu0 %v4380_v20 }
 0x77a   : > { %v2190_v30 = vpop.xlane.xlu0 %2189 }
 0x77e   : > { %2275 = vadd.xlane.f32.xlu0 %v4383_v34 }
 0x782   : > { %v2188_v40 = vpop.xlane.xlu0 %2187 }
 0x783   : > { %v2209_v6 = vsub.f32 %v4325_v31, %v2188_v40  ;;  %v2486_v40 = vpop.f32.mrf.mxu0 }
 0x786   : > { %2169 = vmax.xlane.f32.xlu0 %v4388_v61 }
 0x78a   : > { %v4393_v60 = vpop.xlane.xlu0 %2185 }
 0x78e   : > { %2539 = vmax.xlane.f32.xlu0 %v4396_v5 }
 0x792   : > { %v4399_v62 = vpop.xlane.xlu0 %2183 }
 0x796   : > { %2273 = vadd.xlane.f32.xlu0 %v4401_v23 }
 0x79a   : > { %v2180_v63 = vpop.xlane.xlu0 %2179 }
 0x79b   : > { %v2205_v1 = vsub.f32 %v2157_v24, %v2180_v63 }
 0x79d   : > { %v2227_v39 = vmul.f32 1.442695, %v2205_v1  ;;  %v2235_v1 = vmul.f32 1.442695, %v2209_v6 }
 0x79e   : > { %2167 = vmax.xlane.f32.xlu0 %v4406_v54 }
 0x79f   : > { %3298 = vpow2.f32 %v2227_v39 }
 0x7a0   : > { %3300 = vpow2.f32 %v2239_v43 }
 0x7a2   : > { %v2178_v50 = vpop.xlane.xlu0 %2177 }
 0x7a3   : > { %v2204_v56 = vsub.f32 %v4342_v18, %v2178_v50  ;;  %v2210_v18 = vsub.f32 %v4321_v21, %v2190_v30 }
 0x7a5   : > { %v4415_v38 = vpop.eup %3298  ;;  %v2225_v24 = vmul.f32 1.442695, %v2204_v56  ;;  %v2237_v25 = vmul.f32 1.442695, %v2210_v18 }
 0x7a6   : > { %2259 = vadd.xlane.f32.xlu2 %v4415_v38  ;;  %2537 = vmax.xlane.f32.xlu0 %v4413_v53  ;;  %v4421_v2 = vpop.eup %3300 }
 0x7a7   : > { %3302 = vpow2.f32 %v2225_v24 }
 0x7a8   : > { %3304 = vpow2.f32 %v2237_v25  ;;  %v2494_v25 = vmul.f32 0.17677669, %v4261_v27  ;;  %v2207_v27 = vsub.f32 %v4333_v36, %v4399_v62 }
 0x7aa   : > { %v4419_v57 = vpop.xlane.xlu0 %2547 }
 0x7ad   : > { %v4423_v4 = vpop.eup %3302 }
 0x7ae   : > { %2257 = vadd.xlane.f32.xlu2 %v4423_v4  ;;  %2271 = vadd.xlane.f32.xlu0 %v4421_v2  ;;  %v4436_v21 = vpop.eup %3304 }
 0x7b2   : > { %v2176_v59 = vpop.xlane.xlu0 %2175 }
 0x7b3   : > { %v2203_v55 = vsub.f32 %v4351_v37, %v2176_v59  ;;  %v2495_v37 = vmul.f32 0.17677669, %v4265_v41 }
 0x7b5   : > { %v2223_v26 = vmul.f32 1.442695, %v2203_v55  ;;  %v4446_v10 = vadd.f32 %v2495_v37, %v3811_v11 }
 0x7b6   : > { %2535 = vmax.xlane.f32.xlu0 %v4431_v13 }
 0x7b7   : > { %3306 = vpow2.f32 %v2223_v26  ;;  %v4467_v26 = vadd.f32 %v2494_v25, %v3811_v11 }
 0x7b8   : > { %3308 = vpow2.f32 %v2235_v1 }
 0x7ba   : > { %v4434_v63 = vpop.xlane.xlu0 %2545 }
 0x7bd   : > { %v4438_v30 = vpop.eup %3306 }
 0x7be   : > { %2269 = vadd.xlane.f32.xlu0 %v4436_v21  ;;  %2255 = vadd.xlane.f32.xlu2 %v4438_v30  ;;  %v4450_v56 = vpop.eup %3308 }
 0x7c2   : > { %v2174_v39 = vpop.xlane.xlu0 %2173 }
 0x7c3   : > { %v2202_v12 = vsub.f32 %v4361_v49, %v2174_v39  ;;  %v2504_v49 = vmul.f32 0.17677669, %v2486_v40 }
 0x7c5   : > { %v2221_v43 = vmul.f32 1.442695, %v2202_v12  ;;  %v4457_v18 = vadd.f32 %v2504_v49, %v3786_v52  ;;  %v2231_v12 = vmul.f32 1.442695, %v2207_v27 }
 0x7c6   : > { %2533 = vmax.xlane.f32.xlu0 %v4446_v10 }
 0x7c7   : > { %3310 = vpow2.f32 %v2221_v43 }
 0x7ca   : > { %v2544_v50 = vpop.xlane.xlu0 %2543 }
 0x7cb   : > { %v2564_v31 = vsub.f32 %v4366_v45, %v2544_v50  ;;  %v2208_v45 = vsub.f32 %v4329_v51, %v4393_v60  ;;  %v2493_v51 = vmul.f32 0.17677669, %v4257_v35 }
 0x7cd   : > { %v4452_v24 = vpop.eup %3310  ;;  %v2591_v41 = vmul.f32 1.442695, %v2564_v31  ;;  %v2233_v55 = vmul.f32 1.442695, %v2208_v45  ;;  %v4481_v43 = vadd.f32 %v2493_v51, %v3811_v11 }
 0x7ce   : > { %2267 = vadd.xlane.f32.xlu0 %v4450_v56  ;;  %2253 = vadd.xlane.f32.xlu1 %v4452_v24 }
 0x7cf   : > { %3312 = vpow2.f32 %v2591_v41 }
 0x7d5   : > { %v4459_v28 = vpop.eup %3312 }
 0x7d6   : > { %2623 = vadd.xlane.f32.xlu2 %v4459_v28  ;;  %2551 = vmax.xlane.f32.xlu0 %v4457_v18 }
 0x7d9   : > { %v2278_v59 = vpop.xlane.xlu0 %2277 }
 0x7da   : > { %3314 = vrcp.f32 %v2278_v59 }
 0x7db   : > { %3316 = vpow2.f32 %v2233_v55 }
 0x7de   : > { %2531 = vmax.xlane.f32.xlu0 %v4467_v26 }
 0x7e0   : > { %v3315_v52 = vpop.eup %3314 }
 0x7e1   : > { %v4470_v6 = vpop.xlane.xlu0 %2171  ;;  %v2310_v37 = vmul.f32 %v3315_v52, %v4369_v22  ;;  %v4473_v1 = vpop.eup %3316  ;;  %v2566_v22 = vsub.f32 %v4346_v44, %v4419_v57 }
 0x7e3   : > { %2311 = vmatpush.xpose.msrb.mxu1 %v2310_v37  ;;  %v2595_v36 = vmul.f32 1.442695, %v2566_v22 }
 0x7e6   : > { %2265 = vadd.xlane.f32.xlu0 %v4473_v1 }
 0x7e9   : > { %v2542_v60 = vpop.xlane.xlu0 %2541 }
 0x7ea   : > { %v2563_v39 = vsub.f32 %v4380_v20, %v2542_v60  ;;  %v2550_v20 = vpop.xlane.xlu1 %2549 }
 0x7eb   : > { %v2567_v11 = vsub.f32 %v4287_v58, %v2550_v20 }
 0x7ec   : > { %v2589_v50 = vmul.f32 1.442695, %v2563_v39 }
 0x7ed   : > { %v2597_v57 = vmul.f32 1.442695, %v2567_v11 }
 0x7ee   : > { %3318 = vpow2.f32 %v2589_v50  ;;  %2529 = vmax.xlane.f32.xlu0 %v4481_v43 }
 0x7ef   : > { %3320 = vpow2.f32 %v2231_v12 }
 0x7f1   : > { %v2276_v31 = vpop.xlane.xlu0 %2275 }
 0x7f2   : > { %3322 = vrcp.f32 %v2276_v31 }
 0x7f3   : > { %3324 = vpow2.f32 %v2595_v36  ;;  %v2528_v36 = vpop.xlane.xlu1 %2527 }
 0x7f4   : > { %v4486_v62 = vpop.eup %3318 }
 0x7f5   : > { %v4488_v35 = vpop.eup %3320  ;;  %2621 = vadd.xlane.f32.xlu1 %v4486_v62 }
 0x7f6   : > { %2263 = vadd.xlane.f32.xlu0 %v4488_v35 }
 0x7f8   : > { %v3323_v40 = vpop.eup %3322 }
 0x7f9   : > { %v2170_v41 = vpop.xlane.xlu0 %2169  ;;  %v2309_v49 = vmul.f32 %v3323_v40, %v4383_v34  ;;  %v4495_v25 = vpop.eup %3324 }
 0x7fa   : > { %v2200_v44 = vsub.f32 %v4388_v61, %v2170_v41 }
 0x7fb   : > { %2312 = vmatpush.xpose.msrb.mxu1 %v2309_v49 }
 0x7fc   : > { %v2217_v45 = vmul.f32 1.442695, %v2200_v44 }
 0x7fe   : > { %3326 = vpow2.f32 %v2217_v45  ;;  %2627 = vadd.xlane.f32.xlu0 %v4495_v25 }
 0x7ff   : > { %3328 = vpow2.f32 %v2597_v57 }
 0x801   : > { %v4498_v59 = vpop.xlane.xlu0 %2539 }
 0x804   : > { %v4500_v55 = vpop.eup %3326 }
 0x805   : > { %v4502_v58 = vpop.eup %3328  ;;  %2249 = vadd.xlane.f32.xlu2 %v4500_v55 }
 0x806   : > { %2629 = vadd.xlane.f32.xlu0 %v4502_v58 }
 0x809   : > { %v2274_v34 = vpop.xlane.xlu0 %2273 }
 0x80a   : > { %3330 = vrcp.f32 %v2274_v34  ;;  %v2556_v34 = vsub.f32 %v4291_v29, %v2528_v36 }
 0x810   : > { %v3331_v61 = vpop.eup %3330 }
 0x811   : > { %v2168_v52 = vpop.xlane.xlu0 %2167  ;;  %v2308_v37 = vmul.f32 %v3331_v61, %v4401_v23 }
 0x812   : > { %v2199_v27 = vsub.f32 %v4406_v54, %v2168_v52  ;;  %v2575_v52 = vmul.f32 1.442695, %v2556_v34 }
 0x813   : > { %2313 = vmatpush.xpose.msrb.mxu1 %v2308_v37 }
 0x814   : > { %v2215_v51 = vmul.f32 1.442695, %v2199_v27 }
 0x816   : > { %3332 = vpow2.f32 %v2215_v51 }
 0x819   : > { %v2538_v60 = vpop.xlane.xlu0 %2537 }
 0x81a   : > { %v2561_v39 = vsub.f32 %v4413_v53, %v2538_v60  ;;  %v2526_v53 = vpop.xlane.xlu1 %2525 }
 0x81c   : > { %v4509_v12 = vpop.eup %3332  ;;  %v2585_v50 = vmul.f32 1.442695, %v2561_v39 }
 0x81d   : > { %2247 = vadd.xlane.f32.xlu1 %v4509_v12 }
 0x81e   : > { %3334 = vpow2.f32 %v2585_v50 }
 0x821   : > { %v2272_v22 = vpop.xlane.xlu0 %2271 }
 0x822   : > { %3336 = vrcp.f32 %v2272_v22  ;;  %v4518_v40 = vpop.xlane.xlu1 %2523  ;;  %v2565_v22 = vsub.f32 %v4356_v19, %v4434_v63  ;;  %v2201_v19 = vsub.f32 %v4374_v7, %v4470_v6 }
 0x824   : > { %v4512_v31 = vpop.eup %3334 }
 0x825   : > { %2617 = vadd.xlane.f32.xlu2 %v4512_v31 }
 0x828   : > { %v3337_v23 = vpop.eup %3336 }
 0x829   : > { %v4515_v54 = vpop.xlane.xlu0 %2535  ;;  %v2307_v20 = vmul.f32 %v3337_v23, %v4421_v2 }
 0x82a   : > { %v2522_v2 = vpop.xlane.xlu1 %2521 }
 0x82b   : > { %2314 = vmatpush.xpose.msrb.mxu1 %v2307_v20  ;;  %v2553_v27 = vsub.f32 %v4303_v46, %v2522_v2  ;;  %v2593_v46 = vmul.f32 1.442695, %v2565_v22  ;;  %v754_v2 = vld [vmem:[%s4748_s7 + $0x140] sm:$0xff] }
 0x82c   : > { %3060 = vmatmul.msk.f32.gmra.mxu2 %vm503_vm0, %v754_v2  ;;  %v2718_v22 = vld [vmem:[%s4750_s9] sm:$0xff]  ;;  %v2883_v2 = vld [vmem:[%s4754_s13 + $0x18] sm:$0xff] }
 0x831   : > { %v2270_v11 = vpop.xlane.xlu0 %2269 }
 0x832   : > { %3338 = vrcp.f32 %v2270_v11  ;;  %v2555_v11 = vsub.f32 %v4295_v9, %v2526_v53  ;;  %v2562_v9 = vsub.f32 %v4396_v5, %v4498_v59  ;;  %v2560_v5 = vsub.f32 %v4431_v13, %v4515_v54 }
 0x834   : > { %v2573_v63 = vmul.f32 1.442695, %v2555_v11  ;;  %v2583_v59 = vmul.f32 1.442695, %v2560_v5  ;;  %v2800_v5 = vld [vmem:[%s4752_s11 + $0x8] sm:$0xff] }
 0x838   : > { %v3339_v41 = vpop.eup %3338 }
 0x839   : > { %v2534_v49 = vpop.xlane.xlu0 %2533  ;;  %v2306_v57 = vmul.f32 %v3339_v41, %v4436_v21 }
 0x83a   : > { %v2559_v44 = vsub.f32 %v4446_v10, %v2534_v49  ;;  %v2569_v10 = vmul.f32 1.442695, %v2553_v27  ;;  %v2219_v49 = vmul.f32 1.442695, %v2201_v19  ;;  %v2774_v27 = vld [vmem:[%s4751_s10 + $0x18] sm:$0xff] }
 0x83b   : > { %2315 = vmatpush.xpose.msrb.mxu1 %v2306_v57 }
 0x83c   : > { %v2581_v45 = vmul.f32 1.442695, %v2559_v44  ;;  %v2262_v44 = vpop.xlane.xlu2 %2261 }
 0x83e   : > { %3340 = vpow2.f32 %v2581_v45  ;;  %v2587_v45 = vmul.f32 1.442695, %v2562_v9 }
 0x841   : > { %v2268_v61 = vpop.xlane.xlu0 %2267  ;;  %v2254_v11 = vpop.xlane.xlu1 %2253 }
 0x842   : > { %3342 = vrcp.f32 %v2268_v61 }
 0x843   : > { %3344 = vpow2.f32 %v2575_v52 }
 0x844   : > { %v4523_v37 = vpop.eup %3340  ;;  %3346 = vpow2.f32 %v2569_v10  ;;  %v2260_v61 = vpop.xlane.xlu2 %2259 }
 0x845   : > { %2613 = vadd.xlane.f32.xlu1 %v4523_v37 }
 0x848   : > { %v3343_v51 = vpop.eup %3342 }
 0x849   : > { %v2552_v60 = vpop.xlane.xlu0 %2551  ;;  %v2305_v21 = vmul.f32 %v3343_v51, %v4450_v56  ;;  %v4529_v29 = vpop.eup %3344 }
 0x84a   : > { %v2568_v39 = vsub.f32 %v4457_v18, %v2552_v60  ;;  %v4535_v20 = vpop.eup %3346  ;;  %v755_v60 = vld [vmem:[%s4748_s7 + $0x148] sm:$0xff] }
 0x84b   : > { %2316 = vmatpush.xpose.msrb.mxu1 %v2305_v21  ;;  %3061 = vmatmul.msk.f32.gmra.mxu2 %vm503_vm0, %v755_v60  ;;  %v761_v60 = vld [vmem:[%s4748_s7 + $0x178] sm:$0xff] }
 0x84c   : > { %v2599_v50 = vmul.f32 1.442695, %v2568_v39  ;;  %v2258_v10 = vpop.xlane.xlu2 %2257 }
 0x84d   : > { %2607 = vadd.xlane.f32.xlu1 %v4529_v29 }
 0x84e   : > { %3348 = vpow2.f32 %v2599_v50 }
 0x84f   : > { %3350 = vpow2.f32 %v2593_v46 }
 0x851   : > { %v2532_v36 = vpop.xlane.xlu0 %2531 }
 0x852   : > { %v2558_v23 = vsub.f32 %v4467_v26, %v2532_v36 }
 0x854   : > { %v4537_v56 = vpop.eup %3348  ;;  %v2579_v18 = vmul.f32 1.442695, %v2558_v23  ;;  %v2256_v36 = vpop.xlane.xlu2 %2255  ;;  %v756_v23 = vld [vmem:[%s4748_s7 + $0x150] sm:$0xff] }
 0x855   : > { %2601 = vadd.xlane.f32.xlu1 %v4535_v20  ;;  %2631 = vadd.xlane.f32.xlu0 %v4537_v56  ;;  %v4544_v26 = vpop.eup %3350 }
 0x856   : > { %3352 = vpow2.f32 %v2579_v18  ;;  %v2554_v18 = vsub.f32 %v4299_v14, %v4518_v40  ;;  %3062 = vmatmul.msk.f32.gmra.mxu2 %vm503_vm0, %v756_v23  ;;  %v2771_v14 = vld [vmem:[%s4751_s10] sm:$0xff] }
 0x859   : > { %v2266_v41 = vpop.xlane.xlu0 %2265 }
 0x85a   : > { %3354 = vrcp.f32 %v2266_v41  ;;  %v2571_v41 = vmul.f32 1.442695, %v2554_v18 }
 0x85b   : > { %3356 = vpow2.f32 %v2573_v63 }
 0x85c   : > { %v4546_v57 = vpop.eup %3352  ;;  %3358 = vpow2.f32 %v2219_v49 }
 0x85d   : > { %2625 = vadd.xlane.f32.xlu0 %v4544_v26  ;;  %2611 = vadd.xlane.f32.xlu2 %v4546_v57  ;;  %3360 = vpow2.f32 %v2587_v45 }
 0x860   : > { %v3355_v7 = vpop.eup %3354 }
 0x861   : > { %v2530_v6 = vpop.xlane.xlu0 %2529  ;;  %v2304_v53 = vmul.f32 %v3355_v7, %v4473_v1  ;;  %v4553_v34 = vpop.eup %3356 }
 0x862   : > { %v4555_v52 = vpop.eup %3358  ;;  %v2557_v13 = vsub.f32 %v4481_v43, %v2530_v6  ;;  %v2773_v6 = vld [vmem:[%s4751_s10 + $0x10] sm:$0xff] }
 0x863   : > { %2317 = vmatpush.xpose.msrb.mxu1 %v2304_v53  ;;  %v4568_v51 = vpop.eup %3360 }
 0x864   : > { %v2577_v50 = vmul.f32 1.442695, %v2557_v13  ;;  %v2719_v13 = vld [vmem:[%s4750_s9 + $0x8] sm:$0xff] }
 0x865   : > { %2251 = vadd.xlane.f32.xlu0 %v4555_v52  ;;  %2605 = vadd.xlane.f32.xlu2 %v4553_v34 }
 0x869   : > { %v2264_v1 = vpop.xlane.xlu0 %2263 }
 0x86a   : > { %3362 = vrcp.f32 %v2264_v1  ;;  %v2910_v1 = vld [vmem:[%s4755_s14 + $0x10] sm:$0xff] }
 0x86b   : > { %3364 = vrcp.f32 %v2262_v44 }
 0x86c   : > { %3366 = vpow2.f32 %v2583_v59  ;;  %v760_v59 = vld [vmem:[%s4748_s7 + $0x170] sm:$0xff] }
 0x86d   : > { %2619 = vadd.xlane.f32.xlu0 %v4568_v51  ;;  %3368 = vrcp.f32 %v2260_v61  ;;  %v2772_v61 = vld [vmem:[%s4751_s10 + $0x8] sm:$0xff] }
 0x86e   : > { %2792 = vperm.xlu1 %3160, %v2774_v27   ;;  %3370 = vrcp.f32 %v2258_v10  ;;  %v2720_v27 = vld [vmem:[%s4750_s9 + $0x10] sm:$0xff]  ;;  %v2881_v10 = vld [vmem:[%s4754_s13 + $0x8] sm:$0xff] }
 0x86f   : > { %3372 = vpow2.f32 %v2577_v50  ;;  %v2801_v50 = vld [vmem:[%s4752_s11 + $0x10] sm:$0xff] }
 0x870   : > { %v3363_v54 = vpop.eup %3362  ;;  %3374 = vrcp.f32 %v2256_v36  ;;  %v2799_v36 = vld [vmem:[%s4752_s11] sm:$0xff] }
 0x871   : > { %v2303_v21 = vmul.f32 %v3363_v54, %v4488_v35  ;;  %v3365_v39 = vpop.eup %3364  ;;  %3376 = vrcp.f32 %v2254_v11  ;;  %v2908_v54 = vld [vmem:[%s4755_s14] sm:$0xff] }
 0x872   : > { %v4580_v46 = vpop.eup %3366  ;;  %v2302_v43 = vmul.f32 %v3365_v39, %v4336_v32  ;;  %v2721_v32 = vld [vmem:[%s4750_s9 + $0x18] sm:$0xff]  ;;  %3378 = vpow2.f32 %v2571_v41 }
 0x873   : > { %2318 = vmatpush.xpose.msrb.mxu1 %v2303_v21  ;;  %v3369_v35 = vpop.eup %3368  ;;  %v2802_v21 = vld [vmem:[%s4752_s11 + $0x18] sm:$0xff] }
 0x874   : > { %v2301_v19 = vmul.f32 %v3369_v35, %v4415_v38  ;;  %v3371_v63 = vpop.eup %3370  ;;  %v757_v38 = vld [vmem:[%s4748_s7 + $0x158] sm:$0xff]  ;;  %v2909_v35 = vld [vmem:[%s4755_s14 + $0x8] sm:$0xff] }
 0x875   : > { %2615 = vadd.xlane.f32.xlu0 %v4580_v46  ;;  %v4597_v40 = vpop.eup %3372  ;;  %v2300_v49 = vmul.f32 %v3371_v63, %v4423_v4  ;;  %3063 = vmatmul.msk.f32.gmra.mxu2 %vm503_vm0, %v757_v38  ;;  %v2880_v4 = vld [vmem:[%s4754_s13] sm:$0xff]  ;;  %v2911_v39 = vld [vmem:[%s4755_s14 + $0x18] sm:$0xff]  ;;  %v2622_v63 = vpop.xlane.xlu1 %2621 }
 0x876   : > { %2724 = vperm.xlu1 %3160, %v2718_v22   ;;  %v3375_v44 = vpop.eup %3374  ;;  %v2628_v22 = vpop.xlane.xlu0 %2627 }
 0x877   : > { %2319 = vmatpush.xpose.msrb.mxu1 %v2302_v43  ;;  %v2299_v9 = vmul.f32 %v3375_v44, %v4438_v30  ;;  %v3377_v7 = vpop.eup %3376  ;;  %v758_v30 = vld [vmem:[%s4748_s7 + $0x160] sm:$0xff]  ;;  %v2882_v43 = vld [vmem:[%s4754_s13 + $0x10] sm:$0xff] }
 0x878   : > { %v4612_v53 = vpop.eup %3378  ;;  %v2298_v45 = vmul.f32 %v3377_v7, %v4452_v24  ;;  %v759_v24 = vld [vmem:[%s4748_s7 + $0x168] sm:$0xff] }
 0x87b   : > { %2320 = vmatpush.xpose.msrb.mxu1 %v2301_v19  ;;  %v2624_v19 = vpop.xlane.xlu2 %2623 }
 0x87d   : > { %2739 = vperm.xlu2 %3161, %v2721_v32   ;;  %2609 = vadd.xlane.f32.xlu0 %v4597_v40 }
 0x87e   : > { %2777 = vperm.xlu1 %3160, %v2771_v14   ;;  %3064 = vmatmul.msk.f32.gmra.mxu2 %vm503_vm0, %v758_v30  ;;  %v2630_v23 = vpop.xlane.xlu0 %2629 }
 0x87f   : > { %2321 = vmatpush.xpose.msrb.mxu1 %v2300_v49 }
 0x883   : > { %2322 = vmatpush.xpose.msrb.mxu1 %v2299_v9  ;;  %v2250_v32 = vpop.xlane.xlu2 %2249 }
 0x885   : > { %2787 = vperm.xlu2 %3161, %v2773_v6   ;;  %2603 = vadd.xlane.f32.xlu0 %v4612_v53 }
 0x886   : > { %2886 = vperm.xlu1 %3160, %v2880_v4   ;;  %3065 = vmatmul.msk.f32.gmra.mxu2 %vm503_vm0, %v759_v24 }
 0x887   : > { %2323 = vmatpush.xpose.msrb.mxu1 %v2298_v45 }
 0x88d   : > { %2782 = vperm.xlu2 %3161, %v2772_v61  }
 0x88e   : > { %2901 = vperm.xlu1 %3160, %v2883_v2   ;;  %3066 = vmatmul.msk.f32.gmra.mxu2 %vm503_vm0, %v760_v59 }
 0x890   : > { %v2248_v14 = vpop.xlane.xlu1 %2247 }
 0x895   : > { %2810 = vperm.xlu2 %3161, %v2800_v5  }
 0x896   : > { %2924 = vperm.xlu1 %3160, %v2910_v1   ;;  %3067 = vmatmul.msk.f32.gmra.mxu2 %vm503_vm0, %v761_v60 }
 0x899   : > { %2734 = vperm.xlu0 %3159, %v2720_v27   ;;  %v2618_v27 = vpop.xlane.xlu2 %2617 }
 0x89d   : > { %2891 = vperm.xlu2 %3161, %v2881_v10  }
 0x8a1   : > { %2729 = vperm.xlu0 %3159, %v2719_v13  }
 0x8a5   : > { %2914 = vperm.xlu2 %3161, %v2908_v54  }
 0x8a9   : > { %2820 = vperm.xlu0 %3159, %v2802_v21  }
 0x8ad   : > { %2929 = vperm.xlu2 %3161, %v2911_v39  }
 0x8af   : > { %v1043_v45 = vpop.f32.mrf.mxu2 }
 0x8b1   : > { %2815 = vperm.xlu0 %3159, %v2801_v50  }
 0x8b8   : > { %v2614_v54 = vpop.xlane.xlu1 %2613 }
 0x8b9   : > { %2805 = vperm.xlu0 %3159, %v2799_v36  }
 0x8c1   : > { %2896 = vperm.xlu0 %3159, %v2882_v43  }
 0x8c8   : > { %v2632_v18 = vpop.xlane.xlu0 %2631 }
 0x8c9   : > { %2919 = vperm.xlu0 %3159, %v2909_v35  }
 0x8d0   : > { %v2626_v11 = vpop.xlane.xlu0 %2625  ;;  %v2612_v50 = vpop.xlane.xlu2 %2611 }
 0x8d8   : > { %v2252_v41 = vpop.xlane.xlu0 %2251 }
 0x8d9   : > { %3380 = vrcp.f32 %v2252_v41 }
 0x8da   : > { %3382 = vrcp.f32 %v2250_v32 }
 0x8db   : > { %3384 = vrcp.f32 %v2248_v14 }
 0x8dc   : > { %3386 = vrcp.f32 %v2632_v18  ;;  %v2606_v18 = vpop.xlane.xlu2 %2605 }
 0x8dd   : > { %3388 = vrcp.f32 %v2630_v23  ;;  %v2608_v23 = vpop.xlane.xlu1 %2607 }
 0x8de   : > { %3390 = vrcp.f32 %v2628_v22 }
 0x8df   : > { %v3381_v49 = vpop.eup %3380  ;;  %3392 = vrcp.f32 %v2626_v11 }
 0x8e0   : > { %v2297_v38 = vmul.f32 %v3381_v49, %v4555_v52  ;;  %v3383_v44 = vpop.eup %3382  ;;  %3394 = vrcp.f32 %v2624_v19  ;;  %v2620_v1 = vpop.xlane.xlu0 %2619 }
 0x8e1   : > { %v2296_v9 = vmul.f32 %v3383_v44, %v4500_v55  ;;  %v3385_v7 = vpop.eup %3384  ;;  %v1046_v55 = vpop.f32.mrf.mxu2  ;;  %3396 = vrcp.f32 %v2622_v63 }
 0x8e2   : > { %2324 = vmatpush.xpose.msrb.mxu1 %v2297_v38  ;;  %v3387_v6 = vpop.eup %3386  ;;  %v2295_v4 = vmul.f32 %v3385_v7, %v4509_v12  ;;  %3398 = vrcp.f32 %v2620_v1 }
 0x8e3   : > { %v2664_v30 = vmul.f32 %v3387_v6, %v4537_v56  ;;  %v3389_v61 = vpop.eup %3388  ;;  %3400 = vrcp.f32 %v2618_v27 }
 0x8e4   : > { %v2663_v52 = vmul.f32 %v3389_v61, %v4502_v58  ;;  %v3391_v2 = vpop.eup %3390 }
 0x8e5   : > { %v2662_v24 = vmul.f32 %v3391_v2, %v4495_v25  ;;  %v3393_v5 = vpop.eup %3392 }
 0x8e6   : > { %2325 = vmatpush.xpose.msrb.mxu1 %v2296_v9  ;;  %v2661_v12 = vmul.f32 %v3393_v5, %v4544_v26  ;;  %v3395_v56 = vpop.eup %3394 }
 0x8e7   : > { %v2660_v58 = vmul.f32 %v3395_v56, %v4459_v28  ;;  %v3397_v10 = vpop.eup %3396 }
 0x8e8   : > { %v2616_v60 = vpop.xlane.xlu0 %2615  ;;  %v2659_v25 = vmul.f32 %v3397_v10, %v4486_v62  ;;  %v3399_v13 = vpop.eup %3398 }
 0x8e9   : > { %v1049_v59 = vpop.f32.mrf.mxu2  ;;  %3402 = vrcp.f32 %v2616_v60  ;;  %v2658_v26 = vmul.f32 %v3399_v13, %v4568_v51  ;;  %v3401_v21 = vpop.eup %3400 }
 0x8ea   : > { %2326 = vmatpush.xpose.msrb.mxu1 %v2295_v4  ;;  %3404 = vrcp.f32 %v2614_v54  ;;  %v2657_v28 = vmul.f32 %v3401_v21, %v4512_v31 }
 0x8eb   : > { %3406 = vrcp.f32 %v2612_v50 }
 0x8ed   : > { %2327 = vmatmul.f32.vlgmr.msrb.gmra.mxu1 %v1043_v45 }
 0x8ee   : > { %2665 = vmatpush.xpose.msra.mxu1 %v2664_v30 }
 0x8ef   : > { %v3403_v22 = vpop.eup %3402 }
 0x8f0   : > { %v2610_v36 = vpop.xlane.xlu0 %2609  ;;  %v2656_v62 = vmul.f32 %v3403_v22, %v4580_v46  ;;  %v3405_v43 = vpop.eup %3404 }
 0x8f1   : > { %3408 = vrcp.f32 %v2610_v36  ;;  %v2655_v51 = vmul.f32 %v3405_v43, %v4523_v37  ;;  %v3407_v35 = vpop.eup %3406  ;;  %v2602_v46 = vpop.xlane.xlu1 %2601 }
 0x8f2   : > { %2666 = vmatpush.xpose.msra.mxu1 %v2663_v52  ;;  %3410 = vrcp.f32 %v2608_v23  ;;  %v2654_v11 = vmul.f32 %v3407_v35, %v4546_v57  ;;  %v4761_v35 = vld [vmem:[#allocation3_spill] sm:$0xff] }
 0x8f3   : > { %3412 = vrcp.f32 %v2606_v18 }
 0x8f5   : > { %2330 = vmatmul.f32.gmra.mxu1 %v1046_v55 }
 0x8f6   : > { %2667 = vmatpush.xpose.msra.mxu1 %v2662_v24 }
 0x8f7   : > { %v3409_v31 = vpop.eup %3408 }
 0x8f8   : > { %v1052_v39 = vpop.f32.mrf.mxu2  ;;  %v2604_v19 = vpop.xlane.xlu0 %2603  ;;  %v2653_v63 = vmul.f32 %v3409_v31, %v4597_v40  ;;  %v4762_v31 = vld [vmem:[#allocation4_spill] sm:$0xff] }
 0x8f9   : > { %v3411_v41 = vpop.eup %3410  ;;  %3414 = vrcp.f32 %v2604_v19 }
 0x8fa   : > { %2668 = vmatpush.xpose.msra.mxu1 %v2661_v12  ;;  %v2652_v32 = vmul.f32 %v3411_v41, %v4529_v29  ;;  %v3413_v14 = vpop.eup %3412  ;;  %3416 = vrcp.f32 %v2602_v46  ;;  %v2835_v46 = vld [vmem:[%s4753_s12] sm:$0xff] }
 0x8fb   : > { %v2651_v37 = vmul.f32 %v3413_v14, %v4553_v34 }
 0x8fd   : > { %2333 = vmatmul.f32.gmra.mxu1 %v1049_v59 }
 0x8fe   : > { %2669 = vmatpush.xpose.msra.mxu1 %v2660_v58 }
 0x8ff   : > { %v3415_v49 = vpop.eup %3414 }
 0x900   : > { %v2650_v57 = vmul.f32 %v3415_v49, %v4612_v53  ;;  %v3417_v44 = vpop.eup %3416 }
 0x901   : > { %v1055_v38 = vpop.f32.mrf.mxu2  ;;  %v2649_v40 = vmul.f32 %v3417_v44, %v4535_v20  ;;  %v2698_v20 = vld [vmem:[%s4749_s8] sm:$0xff] }
 0x902   : > { %2670 = vmatpush.xpose.msra.mxu1 %v2659_v25 }
 0x905   : > { %2336 = vmatmul.f32.gmra.mxu1 %v1052_v39 }
 0x906   : > { %2671 = vmatpush.xpose.msra.mxu1 %v2658_v26 }
 0x909   : > { %v1058_v9 = vpop.f32.mrf.mxu2 }
 0x90a   : > { %2672 = vmatpush.xpose.msra.mxu1 %v2657_v28 }
 0x90e   : > { %2673 = vmatpush.xpose.msra.mxu1 %v2656_v62 }
 0x911   : > { %v1061_v7 = vpop.f32.mrf.mxu2 }
 0x912   : > { %2674 = vmatpush.xpose.msra.mxu1 %v2655_v51 }
 0x916   : > { %2675 = vmatpush.xpose.msra.mxu1 %v2654_v11 }
 0x919   : > { %v1064_v29 = vpop.f32.mrf.mxu2 }
 0x91a   : > { %2676 = vmatpush.xpose.msra.mxu1 %v2653_v63 }
 0x91e   : > { %2677 = vmatpush.xpose.msra.mxu1 %v2652_v32  ;;  %v2838_v32 = vld [vmem:[%s4753_s12 + $0x18] sm:$0xff] }
 0x922   : > { %2678 = vmatpush.xpose.msra.mxu1 %v2651_v37 }
 0x926   : > { %2679 = vmatpush.xpose.msra.mxu1 %v2650_v57 }
 0x92a   : > { %2680 = vmatpush.xpose.msra.mxu1 %v2649_v40 }
 0x92d   : > { %2681 = vmatmul.f32.vlgmr.msra.gmra.mxu1 %v1055_v38 }
 0x935   : > { %2684 = vmatmul.f32.gmra.mxu1 %v1058_v9 }
 0x93d   : > { %2687 = vmatmul.f32.gmra.mxu1 %v1061_v7 }
 0x945   : > { %2690 = vmatmul.f32.gmra.mxu1 %v1064_v29 }
 0x96a   : > { %v2328_v6 = vpop.f32.mrf.mxu1 }
 0x972   : > { %v2331_v4 = vpop.f32.mrf.mxu1 }
 0x97a   : > { %v2334_v34 = vpop.f32.mrf.mxu1 }
 0x982   : > { %v2337_v45 = vpop.f32.mrf.mxu1 }
 0x9aa   : > { %v2682_v30 = vpop.f32.mrf.mxu1 }
 0x9b2   : > { %v2685_v61 = vpop.f32.mrf.mxu1 }
 0x9ba   : > { %v2688_v53 = vpop.f32.mrf.mxu1 }
 0x9c2   : > { %v2691_v52 = vpop.f32.mrf.mxu1 }
 0x9c3   : > { %2742 = vmatpush.msrb.mxu1 %v2691_v52 }
 0x9c5   : > { %2743 = vmatpush.msrb.mxu1 %v2688_v53 }
 0x9c7   : > { %2744 = vmatpush.msrb.mxu1 %v2685_v61 }
 0x9c9   : > { %2745 = vmatpush.msrb.mxu1 %v2682_v30 }
 0x9cb   : > { %2746 = vmatpush.msrb.mxu1 %v2337_v45 }
 0x9cd   : > { %2747 = vmatpush.msrb.mxu1 %v2334_v34 }
 0x9cf   : > { %2748 = vmatpush.msrb.mxu1 %v2331_v4 }
 0x9d1   : > { %2749 = vmatpush.msrb.mxu1 %v2328_v6 }
 0x9d3   : > { %2750 = vmatpush.msrb.mxu1 %v4249_v8  ;;  %v2793_v8 = vpop.permute.xlu1 %2792 }
 0x9d5   : > { %2751 = vmatpush.msrb.mxu1 %v4245_v48  ;;  %v2699_v48 = vld [vmem:[%s4749_s8 + $0x8] sm:$0xff] }
 0x9d7   : > { %2752 = vmatpush.msrb.mxu1 %v4240_v16 }
 0x9d9   : > { %2753 = vmatpush.msrb.mxu1 %v4236_v3  ;;  %v2740_v3 = vpop.permute.xlu2 %2739 }
 0x9db   : > { %2754 = vmatpush.msrb.mxu1 %v4231_v0  ;;  %v2700_v0 = vld [vmem:[%s4749_s8 + $0x10] sm:$0xff]  ;;  %v2725_v5 = vpop.permute.xlu1 %2724 }
 0x9dd   : > { %2755 = vmatpush.msrb.mxu1 %v4227_v47  ;;  %v2735_v47 = vpop.permute.xlu0 %2734 }
 0x9df   : > { %2756 = vmatpush.msrb.mxu1 %v4222_v33  ;;  %v2701_v33 = vld [vmem:[%s4749_s8 + $0x18] sm:$0xff] }
 0x9e1   : > { %2757 = vmatpush.msrb.mxu1 %v4218_v42  ;;  %v2788_v2 = vpop.permute.xlu2 %2787 }
 0x9e2   : > { %2758 = vmatmul.f32.vlgmr.msrb.gmra.mxu1 %v2698_v20 }
 0x9e3   : > { %v2778_v54 = vpop.permute.xlu1 %2777 }
 0x9e5   : > { %v2730_v16 = vpop.permute.xlu0 %2729 }
 0x9e9   : > { %v2783_v12 = vpop.permute.xlu2 %2782 }
 0x9ea   : > { %2761 = vmatmul.f32.gmra.mxu1 %v2699_v48 }
 0x9eb   : > { %v2887_v37 = vpop.permute.xlu1 %2886 }
 0x9ed   : > { %v2821_v24 = vpop.permute.xlu0 %2820 }
 0x9f1   : > { %v2811_v50 = vpop.permute.xlu2 %2810 }
 0x9f2   : > { %2764 = vmatmul.f32.gmra.mxu1 %v2700_v0 }
 0x9f3   : > { %v2902_v29 = vpop.permute.xlu1 %2901 }
 0x9f5   : > { %v2816_v59 = vpop.permute.xlu0 %2815 }
 0x9f9   : > { %v2892_v14 = vpop.permute.xlu2 %2891 }
 0x9fa   : > { %2767 = vmatmul.f32.gmra.mxu1 %v2701_v33 }
 0x9fb   : > { %v2925_v20 = vpop.permute.xlu1 %2924 }
 0x9fd   : > { %v2806_v36 = vpop.permute.xlu0 %2805 }
 0xa01   : > { %v2915_v44 = vpop.permute.xlu2 %2914 }
 0xa05   : > { %v2897_v49 = vpop.permute.xlu0 %2896 }
 0xa0d   : > { %v2920_v34 = vpop.permute.xlu0 %2919 }
 0xa5f   : > { %v2759_v42 = vpop.f32.mrf.mxu1 }
 0xa60   : > { %v2760_v58 = vadd.f32 %v2759_v42, %v2725_v5 }
 0xa62   : > { %v2795_v26 = vmul.f32 %v2778_v54, %v2760_v58 }
 0xa64   : > { %v2823_v62 = vadd.f32 %v2806_v36, %v2795_v26 }
 0xa66   : > { %v2827_v19 = vadd.f32 %v2823_v62, %v4762_v31 }
 0xa67   : > { %v2762_v55 = vpop.f32.mrf.mxu1 }
 0xa68   : > { %v2763_v27 = vadd.f32 %v2762_v55, %v2730_v16  ;;  %v2831_v41 = vmax.f32 %v2827_v19, 0.0  ;;  %v2930_v16 = vpop.permute.xlu2 %2929 }
 0xa6a   : > { %v2796_v25 = vmul.f32 %v2783_v12, %v2763_v27 }
 0xa6c   : > { %v2824_v28 = vadd.f32 %v2811_v50, %v2796_v25 }
 0xa6e   : > { %v2828_v18 = vadd.f32 %v2824_v28, %v4761_v35 }
 0xa6f   : > { %v2765_v1 = vpop.f32.mrf.mxu1 }
 0xa70   : > { %v2766_v56 = vadd.f32 %v2765_v1, %v2735_v47  ;;  %v2832_v63 = vmax.f32 %v2828_v18, 0.0 }
 0xa72   : > { %v2797_v10 = vmul.f32 %v2788_v2, %v2766_v56 }
 0xa74   : > { %v2825_v21 = vadd.f32 %v2816_v59, %v2797_v10 }
 0xa76   : > { %v2829_v23 = vadd.f32 %v2825_v21, %v3627_v17  ;;  %v2837_v17 = vld [vmem:[%s4753_s12 + $0x10] sm:$0xff] }
 0xa77   : > { %v2768_v60 = vpop.f32.mrf.mxu1 }
 0xa78   : > { %v2769_v13 = vadd.f32 %v2768_v60, %v2740_v3  ;;  %v2833_v11 = vmax.f32 %v2829_v23, 0.0 }
 0xa7a   : > { %v2798_v39 = vmul.f32 %v2793_v8, %v2769_v13 }
 0xa7c   : > { %v2826_v22 = vadd.f32 %v2821_v24, %v2798_v39 }
 0xa7e   : > { %v2830_v43 = vadd.f32 %v2826_v22, %v3622_v15  ;;  %v2836_v15 = vld [vmem:[%s4753_s12 + $0x8] sm:$0xff] }
 0xa80   : > { %v2834_v51 = vmax.f32 %v2830_v43, 0.0 }
 0xa82   : > { %2863 = vmatpush.msrb.mxu3 %v2834_v51 }
 0xa84   : > { %2864 = vmatpush.msrb.mxu3 %v2833_v11 }
 0xa86   : > { %2865 = vmatpush.msrb.mxu3 %v2832_v63 }
 0xa88   : > { %2866 = vmatpush.msrb.mxu3 %v2831_v41 }
 0xa89   : > { %3132 = vmatmul.msk.f32.vlgmr.msrb.gmra.mxu3 %vm503_vm0, %v2835_v46 }
 0xa91   : > { %3133 = vmatmul.msk.f32.gmra.mxu3 %vm503_vm0, %v2836_v15 }
 0xa99   : > { %3134 = vmatmul.msk.f32.gmra.mxu3 %vm503_vm0, %v2837_v17 }
 0xaa1   : > { %3135 = vmatmul.msk.f32.gmra.mxu3 %vm503_vm0, %v2838_v32 }
 0xb0c   : > { %v2868_v57 = vpop.f32.mrf.mxu3 }
 0xb0d   : > { %v2904_v38 = vmul.f32 %v2887_v37, %v2868_v57 }
 0xb0f   : > { %v2932_v40 = vadd.f32 %v2915_v44, %v2904_v38 }
 0xb11   : > { %v2936_v9 = vadd.f32 %v2932_v40, %v2831_v41 }
 0xb13   : > { %v2940_v7 = vmax.f32 %v2936_v9, 0.0 }
 0xb14   : > { %v2871_v6 = vpop.f32.mrf.mxu3 }
 0xb15   : > { %2944 = vst [vmem:[%s494_s21] sm:$0xff] %v2940_v7  ;;  %v2905_v4 = vmul.f32 %v2892_v14, %v2871_v6 }
 0xb17   : > { %v2933_v45 = vadd.f32 %v2920_v34, %v2905_v4 }
 0xb19   : > { %v2937_v30 = vadd.f32 %v2933_v45, %v2832_v63 }
 0xb1b   : > { %v2941_v61 = vmax.f32 %v2937_v30, 0.0 }
 0xb1c   : > { %v2874_v53 = vpop.f32.mrf.mxu3 }
 0xb1d   : > { %2945 = vst [vmem:[%s494_s21 + $0x8] sm:$0xff] %v2941_v61  ;;  %v2906_v52 = vmul.f32 %v2897_v49, %v2874_v53 }
 0xb1f   : > { %v2934_v48 = vadd.f32 %v2925_v20, %v2906_v52 }
 0xb21   : > { %v2938_v0 = vadd.f32 %v2934_v48, %v2833_v11 }
 0xb23   : > { %v2942_v33 = vmax.f32 %v2938_v0, 0.0 }
 0xb24   : > { %v2877_v47 = vpop.f32.mrf.mxu3 }
 0xb25   : > { %2946 = vst [vmem:[%s494_s21 + $0x10] sm:$0xff] %v2942_v33  ;;  %v2907_v3 = vmul.f32 %v2902_v29, %v2877_v47 }
 0xb27   : > { %v2935_v42 = vadd.f32 %v2930_v16, %v2907_v3 }
 0xb29   : > { %v2939_v8 = vadd.f32 %v2935_v42, %v2834_v51 }
 0xb2b   : > { %v2943_v2 = vmax.f32 %v2939_v8, 0.0 }
 0xb2d   : > { %2947 = vst [vmem:[%s494_s21 + $0x18] sm:$0xff] %v2943_v2 }
 0xb2e PF: > { %s25_s18 = sadd.s32 1, %s3424_s18  }
 0xb2f   : > { %p22_p4 = scmp.ge.s32.totalorder %s25_s18, 4  }
 0xb31   :  { %24 = sbr.rel (!%p22_p4) target bundleno = 1 (0x1), region = 110 }

</bundles_post_ra>
